<compile_context>
chip_gen: v6e
topology: v6e:2x2x1
jax: 0.10.0
libtpu: 0.0.40
codegen_flags: <defaults>
</compile_context>

<pallas_src>
import jax
import jax.numpy as jnp
from jax.experimental import pallas as pl
from jax.experimental.pallas import tpu as pltpu

IN_DIM = 1024
H1_DIM = 512
H2_DIM = 256
OUT_DIM = 40
OUT_PAD = 128          # lane-dense output slab; sliced to OUT_DIM in the wrapper
BN_EPS = 1e-5


def _classifier_head_kernel(
    x_ref,    # (TB, 1024)  bf16/f32  feature tile
    w1_ref,   # (1024, 512) bf16      linear1 weight with BN1 scale folded in
    t1_ref,   # (1, 512)    f32       BN1 shift
    w2_ref,   # (512, 256)  bf16      linear2 weight with BN2 scale folded in
    t2_ref,   # (1, 256)    f32       folded bias: b2*scale2 + shift2
    w3_ref,   # (256, 128)  bf16      linear3 weight, lane-padded 40 -> 128
    b3_ref,   # (1, 128)    f32       linear3 bias, lane-padded
    o_ref,    # (TB, 128)   f32       logits (cols >= 40 are padding)
):
    # In-body cast: no-op when the producer already emits bf16, and avoids a
    # separate wrapper-side HBM cast pass when it does not.
    x = x_ref[...].astype(jnp.bfloat16)

    # linear1 (bias=False, BN1 folded) -> relu          [dropout eval = identity]
    h1 = jnp.dot(x, w1_ref[...], preferred_element_type=jnp.float32)
    h1 = jnp.maximum(h1 + t1_ref[...], 0.0).astype(jnp.bfloat16)

    # linear2 (+bias, BN2 folded) -> relu               [dropout eval = identity]
    h2 = jnp.dot(h1, w2_ref[...], preferred_element_type=jnp.float32)
    h2 = jnp.maximum(h2 + t2_ref[...], 0.0).astype(jnp.bfloat16)

    # linear3 (+bias), lane-dense (TB, 128) store
    o_ref[...] = (
        jnp.dot(h2, w3_ref[...], preferred_element_type=jnp.float32) + b3_ref[...]
    )


def _batch_tile(B):
    """Pick the batch tile (rows per grid step)."""
    if B <= 16:
        # Single full-array block: exempt from the sublane-multiple rule and
        # incurs exactly one grid step of overhead.
        return B
    # >= 2 grid steps so v7x megacore ("parallel") shards the batch over both
    # TensorCores; cap at 2048 rows (per-step MXU work ~3 us vs ~0.35 us step
    # overhead) and round to 16 rows so bf16 vregs stay fully packed.
    tb = -(-B // 2)                 # ceil(B / 2)
    tb = -(-tb // 16) * 16          # round up to a multiple of 16
    return min(2048, tb)


@jax.jit
def classifier_head(feats, params):
    """feats: (B, 1024) float (ideally bf16) -> logits (B, 40) float32."""
    B = feats.shape[0]
    TB = _batch_tile(B)
    steps = -(-B // TB)             # cdiv grid: partial last tile, no batch padding

    # Weight/bias specs return the same block for every grid step -> they stay
    # VMEM-resident (no re-DMA across batch tiles).
    rep = lambda shape: pl.BlockSpec(shape, lambda i: (0, 0))

    # Triple-buffer the activation input when there are enough steps for it to
    # matter (hides DMA jitter on v6e, where input DMA time ~= MXU time).
    if steps >= 3:
        x_spec = pl.BlockSpec((TB, IN_DIM), lambda i: (i, 0),
                              pipeline_mode=pl.Buffered(3))
    else:
        x_spec = pl.BlockSpec((TB, IN_DIM), lambda i: (i, 0))

    w_bytes = (
        params["w1"].size * params["w1"].dtype.itemsize
        + params["t1"].size * params["t1"].dtype.itemsize
        + params["w2"].size * params["w2"].dtype.itemsize
        + params["t2"].size * params["t2"].dtype.itemsize
        + params["w3"].size * params["w3"].dtype.itemsize
        + params["b3"].size * params["b3"].dtype.itemsize
    )
    cost = pl.CostEstimate(
        flops=2 * B * (IN_DIM * H1_DIM + H1_DIM * H2_DIM + H2_DIM * OUT_PAD),
        transcendentals=0,
        bytes_accessed=B * IN_DIM * feats.dtype.itemsize + B * OUT_PAD * 4 + w_bytes,
    )

    out = pl.pallas_call(
        _classifier_head_kernel,
        out_shape=jax.ShapeDtypeStruct((B, OUT_PAD), jnp.float32),
        grid_spec=pltpu.PrefetchScalarGridSpec(
            num_scalar_prefetch=0,
            grid=(steps,),
            in_specs=[
                x_spec,
                rep((IN_DIM, H1_DIM)),
                rep((1, H1_DIM)),
                rep((H1_DIM, H2_DIM)),
                rep((1, H2_DIM)),
                rep((H2_DIM, OUT_PAD)),
                rep((1, OUT_PAD)),
            ],
            out_specs=pl.BlockSpec((TB, OUT_PAD), lambda i: (i, 0)),
        ),
        compiler_params=pltpu.CompilerParams(
            dimension_semantics=("parallel",),      # v7x: shard batch over 2 TCs
            vmem_limit_bytes=48 << 20,              # <= v7x 64 MiB/TC; ample on v5e/v6e
        ),
        cost_estimate=cost,
    )(
        feats,
        params["w1"], params["t1"],
        params["w2"], params["t2"],
        params["w3"], params["b3"],
    )

    return out[:, :OUT_DIM]


def classifier_head_ref(feats, params):
    """Pure-JAX reference of the same (folded, bf16) math for validation."""
    x = feats.astype(jnp.bfloat16)
    h1 = jnp.maximum(
        jnp.dot(x, params["w1"], preferred_element_type=jnp.float32) + params["t1"], 0.0
    ).astype(jnp.bfloat16)
    h2 = jnp.maximum(
        jnp.dot(h1, params["w2"], preferred_element_type=jnp.float32) + params["t2"], 0.0
    ).astype(jnp.bfloat16)
    out = jnp.dot(h2, params["w3"], preferred_element_type=jnp.float32) + params["b3"]
    return out[:, :OUT_DIM]


def init_params(key):
    """Synthetic parameters matching the module, BN + biases pre-folded."""
    ks = jax.random.split(key, 9)

    def lin_w(k, fan_in, fan_out):
        bound = 1.0 / jnp.sqrt(fan_in)
        return jax.random.uniform(k, (fan_in, fan_out), jnp.float32, -bound, bound)

    def lin_b(k, fan_in, fan_out):
        bound = 1.0 / jnp.sqrt(fan_in)
        return jax.random.uniform(k, (fan_out,), jnp.float32, -bound, bound)

    def bn_fold(kg, kb, dim):
        gamma = 1.0 + 0.01 * jax.random.normal(kg, (dim,), jnp.float32)
        beta = 0.01 * jax.random.normal(kb, (dim,), jnp.float32)
        mean = 0.05 * jax.random.normal(jax.random.fold_in(kb, 1), (dim,), jnp.float32)
        var = jnp.abs(
            1.0 + 0.05 * jax.random.normal(jax.random.fold_in(kg, 1), (dim,), jnp.float32)
        )
        scale = gamma * jax.lax.rsqrt(var + BN_EPS)
        shift = beta - mean * scale
        return scale, shift

    w1 = lin_w(ks[0], IN_DIM, H1_DIM)                 # linear1 (bias=False)
    w2 = lin_w(ks[1], H1_DIM, H2_DIM)                 # linear2
    b2 = lin_b(ks[2], H1_DIM, H2_DIM)
    w3 = lin_w(ks[3], H2_DIM, OUT_DIM)                # linear3
    b3 = lin_b(ks[4], H2_DIM, OUT_DIM)

    s1, t1 = bn_fold(ks[5], ks[6], H1_DIM)
    s2, t2 = bn_fold(ks[7], ks[8], H2_DIM)

    # Fold BN scale into weight columns; fold linear2 bias through BN2.
    w1f = (w1 * s1[None, :]).astype(jnp.bfloat16)
    w2f = (w2 * s2[None, :]).astype(jnp.bfloat16)
    t2f = b2 * s2 + t2

    # Lane-pad the 40-wide output projection to 128 (zero columns).
    w3p = jnp.zeros((H2_DIM, OUT_PAD), jnp.float32).at[:, :OUT_DIM].set(w3)
    b3p = jnp.zeros((1, OUT_PAD), jnp.float32).at[0, :OUT_DIM].set(b3)

    return {
        "w1": w1f, "t1": t1.reshape(1, H1_DIM),
        "w2": w2f, "t2": t2f.reshape(1, H2_DIM),
        "w3": w3p.astype(jnp.bfloat16), "b3": b3p,
    }


def sub_function_stub(x_nchw, n_points=IN_DIM):
    # TODO(synk): `sub_function` and `online_encoder` are external callables
    # injected via __init__ (point sampler + frozen encoder); stand-in here is
    # a deterministic flatten to a 1024-dim feature per example.
    B = x_nchw.shape[0]
    flat = x_nchw.reshape(B, -1)[:, :n_points]
    # Emit bf16 directly (fuses into this op) so the kernel's input HBM read is
    # halved and no separate cast pass is needed in the classifier wrapper.
    return flat.astype(jnp.bfloat16)


def shape_classifier_forward(x_nchw, params):
    feats = sub_function_stub(x_nchw, IN_DIM)        # (B, 1024) encoder stub, bf16
    return classifier_head(feats, params)            # (B, 40) logits, f32


if __name__ == "__main__":
    key = jax.random.PRNGKey(0)
    k_x, k_p = jax.random.split(key)

    # NCHW input: batch=2, channels=4, spatial=16x16 => 4*16*16 = 1024 features
    x = jax.random.normal(k_x, (2, 4, 16, 16), jnp.float32)
    params = init_params(k_p)

    logits = shape_classifier_forward(x, params)
    jax.block_until_ready(logits)

    assert logits.shape == (2, OUT_DIM) and logits.dtype == jnp.float32
    assert bool(jnp.all(jnp.isfinite(logits)))

    ref = classifier_head_ref(sub_function_stub(x, IN_DIM), params)
    assert bool(jnp.allclose(logits, ref, rtol=1e-2, atol=1e-2))

    print("KERNEL_OK")
</pallas_src>

<mosaic_0001>
module attributes {stable_mosaic.version = 11 : i64} {
  func.func @_classifier_head_kernel(%arg0: i32, %arg1: memref<2x1024xbf16, #tpu.memory_space<vmem>>, %arg2: memref<1024x512xbf16, #tpu.memory_space<vmem>>, %arg3: memref<1x512xf32, #tpu.memory_space<vmem>>, %arg4: memref<512x256xbf16, #tpu.memory_space<vmem>>, %arg5: memref<1x256xf32, #tpu.memory_space<vmem>>, %arg6: memref<256x128xbf16, #tpu.memory_space<vmem>>, %arg7: memref<1x128xf32, #tpu.memory_space<vmem>>, %arg8: memref<2x128xf32, #tpu.memory_space<vmem>>) attributes {dimension_semantics = [#tpu.dimension_semantics<parallel>], iteration_bounds = array<i64: 1>, scalar_prefetch = 0 : i64, scratch_operands = 0 : i64, tpu.core_type = #tpu.core_type<tc>, window_params = [{transform_indices = @transform_0, window_bounds = array<i64: 2, 1024>}, {pipeline_mode = #tpu.pipeline_mode<synchronous>, transform_indices = @transform_1, window_bounds = array<i64: 1024, 512>}, {pipeline_mode = #tpu.pipeline_mode<synchronous>, transform_indices = @transform_2, window_bounds = array<i64: 1, 512>}, {pipeline_mode = #tpu.pipeline_mode<synchronous>, transform_indices = @transform_3, window_bounds = array<i64: 512, 256>}, {pipeline_mode = #tpu.pipeline_mode<synchronous>, transform_indices = @transform_4, window_bounds = array<i64: 1, 256>}, {pipeline_mode = #tpu.pipeline_mode<synchronous>, transform_indices = @transform_5, window_bounds = array<i64: 256, 128>}, {pipeline_mode = #tpu.pipeline_mode<synchronous>, transform_indices = @transform_6, window_bounds = array<i64: 1, 128>}, {transform_indices = @transform_7, window_bounds = array<i64: 2, 128>}]} {
    %c0 = arith.constant 0 : index
    %c0_0 = arith.constant 0 : index
    %0 = vector.load %arg1[%c0, %c0_0] : memref<2x1024xbf16, #tpu.memory_space<vmem>>, vector<2x1024xbf16>
    %c0_1 = arith.constant 0 : index
    %c0_2 = arith.constant 0 : index
    %1 = vector.load %arg2[%c0_1, %c0_2] : memref<1024x512xbf16, #tpu.memory_space<vmem>>, vector<1024x512xbf16>
    %cst = arith.constant dense<0.000000e+00> : vector<2x512xf32>
    %2 = tpu.matmul %0, %1, %cst {dimension_numbers = #tpu.dot_dimension_numbers<[1], [0], [0], [1], [0, 0, 1, 1], [], []>} : vector<2x1024xbf16>, vector<1024x512xbf16>, vector<2x512xf32> -> vector<2x512xf32>
    %c0_3 = arith.constant 0 : index
    %c0_4 = arith.constant 0 : index
    %3 = vector.load %arg3[%c0_3, %c0_4] : memref<1x512xf32, #tpu.memory_space<vmem>>, vector<1x512xf32>
    %4 = vector.broadcast %3 : vector<1x512xf32> to vector<2x512xf32>
    %5 = arith.addf %2, %4 : vector<2x512xf32>
    %cst_5 = arith.constant 0.000000e+00 : f32
    %6 = vector.broadcast %cst_5 : f32 to vector<2x512xf32>
    %7 = arith.maximumf %5, %6 : vector<2x512xf32>
    %8 = arith.truncf %7 : vector<2x512xf32> to vector<2x512xbf16>
    %c0_6 = arith.constant 0 : index
    %c0_7 = arith.constant 0 : index
    %9 = vector.load %arg4[%c0_6, %c0_7] : memref<512x256xbf16, #tpu.memory_space<vmem>>, vector<512x256xbf16>
    %cst_8 = arith.constant dense<0.000000e+00> : vector<2x256xf32>
    %10 = tpu.matmul %8, %9, %cst_8 {dimension_numbers = #tpu.dot_dimension_numbers<[1], [0], [0], [1], [0, 0, 1, 1], [], []>} : vector<2x512xbf16>, vector<512x256xbf16>, vector<2x256xf32> -> vector<2x256xf32>
    %c0_9 = arith.constant 0 : index
    %c0_10 = arith.constant 0 : index
    %11 = vector.load %arg5[%c0_9, %c0_10] : memref<1x256xf32, #tpu.memory_space<vmem>>, vector<1x256xf32>
    %12 = vector.broadcast %11 : vector<1x256xf32> to vector<2x256xf32>
    %13 = arith.addf %10, %12 : vector<2x256xf32>
    %cst_11 = arith.constant 0.000000e+00 : f32
    %14 = vector.broadcast %cst_11 : f32 to vector<2x256xf32>
    %15 = arith.maximumf %13, %14 : vector<2x256xf32>
    %16 = arith.truncf %15 : vector<2x256xf32> to vector<2x256xbf16>
    %c0_12 = arith.constant 0 : index
    %c0_13 = arith.constant 0 : index
    %17 = vector.load %arg6[%c0_12, %c0_13] : memref<256x128xbf16, #tpu.memory_space<vmem>>, vector<256x128xbf16>
    %cst_14 = arith.constant dense<0.000000e+00> : vector<2x128xf32>
    %18 = tpu.matmul %16, %17, %cst_14 {dimension_numbers = #tpu.dot_dimension_numbers<[1], [0], [0], [1], [0, 0, 1, 1], [], []>} : vector<2x256xbf16>, vector<256x128xbf16>, vector<2x128xf32> -> vector<2x128xf32>
    %c0_15 = arith.constant 0 : index
    %c0_16 = arith.constant 0 : index
    %19 = vector.load %arg7[%c0_15, %c0_16] : memref<1x128xf32, #tpu.memory_space<vmem>>, vector<1x128xf32>
    %20 = vector.broadcast %19 : vector<1x128xf32> to vector<2x128xf32>
    %21 = arith.addf %18, %20 : vector<2x128xf32>
    %c0_17 = arith.constant 0 : index
    %c0_18 = arith.constant 0 : index
    %22 = vector.load %arg8[%c0_17, %c0_18] : memref<2x128xf32, #tpu.memory_space<vmem>>, vector<2x128xf32>
    tpu.vector_store %arg8[%c0_17, %c0_18], %21 {strides = array<i32>} : memref<2x128xf32, #tpu.memory_space<vmem>>, vector<2x128xf32>,
    return
  }
  func.func @transform_0(%arg0: i32) -> (i32, i32) {
    %c0_i32 = arith.constant 0 : i32
    %c0_i32_0 = arith.constant 0 : i32
    return %arg0, %c0_i32 : i32, i32
  }
  func.func @transform_1(%arg0: i32) -> (i32, i32) {
    %c0_i32 = arith.constant 0 : i32
    %c0_i32_0 = arith.constant 0 : i32
    %c0_i32_1 = arith.constant 0 : i32
    return %c0_i32, %c0_i32_0 : i32, i32
  }
  func.func @transform_2(%arg0: i32) -> (i32, i32) {
    %c0_i32 = arith.constant 0 : i32
    %c0_i32_0 = arith.constant 0 : i32
    %c0_i32_1 = arith.constant 0 : i32
    return %c0_i32, %c0_i32_0 : i32, i32
  }
  func.func @transform_3(%arg0: i32) -> (i32, i32) {
    %c0_i32 = arith.constant 0 : i32
    %c0_i32_0 = arith.constant 0 : i32
    %c0_i32_1 = arith.constant 0 : i32
    return %c0_i32, %c0_i32_0 : i32, i32
  }
  func.func @transform_4(%arg0: i32) -> (i32, i32) {
    %c0_i32 = arith.constant 0 : i32
    %c0_i32_0 = arith.constant 0 : i32
    %c0_i32_1 = arith.constant 0 : i32
    return %c0_i32, %c0_i32_0 : i32, i32
  }
  func.func @transform_5(%arg0: i32) -> (i32, i32) {
    %c0_i32 = arith.constant 0 : i32
    %c0_i32_0 = arith.constant 0 : i32
    %c0_i32_1 = arith.constant 0 : i32
    return %c0_i32, %c0_i32_0 : i32, i32
  }
  func.func @transform_6(%arg0: i32) -> (i32, i32) {
    %c0_i32 = arith.constant 0 : i32
    %c0_i32_0 = arith.constant 0 : i32
    %c0_i32_1 = arith.constant 0 : i32
    return %c0_i32, %c0_i32_0 : i32, i32
  }
  func.func @transform_7(%arg0: i32) -> (i32, i32) {
    %c0_i32 = arith.constant 0 : i32
    %c0_i32_0 = arith.constant 0 : i32
    return %arg0, %c0_i32 : i32, i32
  }
}

</mosaic_0001>

<bundles_post_ra>
// kernel: classifier_head.1
= control target key start
LH: loop header
LB: loop body
LE: loop exit
PB: predicated region body
PF: predicated region fallthrough
CT: control target
= control target key end

     0   :  { %12 = vsyncpa [#allocation3], 0  ;;  %s3867_s0 = inlined_call_operand.hbm [shape: bf16[2,1024], index: 0, kind: input, shape index: {}]   ;;  %s3868_s1 = inlined_call_operand.hbm [shape: bf16[1024,512], index: 1, kind: input, shape index: {}]   ;;  %s3869_s2 = inlined_call_operand.hbm [shape: f32[1,512], index: 2, kind: input, shape index: {}]   ;;  %s3870_s3 = inlined_call_operand.hbm [shape: bf16[512,256], index: 3, kind: input, shape index: {}]   ;;  %s3871_s4 = inlined_call_operand.vmem [shape: f32[1,256], index: 4, kind: input, shape index: {}]   ;;  %s3872_s5 = inlined_call_operand.hbm [shape: bf16[256,128], index: 5, kind: input, shape index: {}]   ;;  %s3873_s6 = inlined_call_operand.vmem [shape: f32[1,128], index: 6, kind: input, shape index: {}]   ;;  %s3874_s7 = inlined_call_operand.hbm [shape: f32[2,128], index: 7, kind: output, shape index: {}]  }
   0x1   :  { %13 = vsyncpa [#allocation6], 0 }
   0x2   :  { %14 = vsyncpa [#allocation9], 0 }
   0x3   :  { %15 = vsyncpa [#allocation4], 0  ;;  %s3717_s24 = smov [#allocation5]  }
   0x4   :  { %s31_s25 = sshll.u32 %s3717_s24, 4  ;;  %s32_s25 = int_to_ptr.vmem [resolvable:$true] %s31_s25 }
   0x5   :  { %s3597_s26 = scalar_lea.vmem %s32_s25, 32768  ;;  %p3602_p1 = scmp.lt.s32.totalorder %s32_s25, %s32_s25 }
   0x6   :  { %p3598_p0 = scmp.ne.s32.totalorder %s32_s25, %s3597_s26  ;;  %p3603_p2 = scmp.lt.s32.totalorder %s3597_s26, %s3597_s26 }
   0x8   :  { %p3604_p3 = por %p3603_p2, %p3602_p1 }
   0xa   :  { %p3605_p4 = pnand %p3604_p3, %p3598_p0 }
   0xc   :  { %3608 = shalt.err (!%p3605_p4)
}
   0xd   :  { %s3718_s27 = smov 256   ;;  %s3719_s28 = smov 16  }
   0xe   :  { %37 = dma.hbm_to_vmem [thread:$0]  %s3868_s1, 32768, %s32_s25, [#allocation6], %s3718_s27, %s3718_s27, %s3719_s28  }
   0xf   :  { %s3720_s8 = smov [#allocation8]  }
  0x10   :  { %s53_s9 = sshll.u32 %s3720_s8, 4  ;;  %s54_s9 = int_to_ptr.vmem [resolvable:$true] %s53_s9 }
  0x11   :  { %s3617_s10 = scalar_lea.vmem %s54_s9, 8192  ;;  %p3622_p6 = scmp.lt.s32.totalorder %s54_s9, %s54_s9 }
  0x12   :  { %p3618_p5 = scmp.ne.s32.totalorder %s54_s9, %s3617_s10  ;;  %p3623_p7 = scmp.lt.s32.totalorder %s3617_s10, %s3617_s10 }
  0x14   :  { %p3624_p8 = por %p3623_p7, %p3622_p6 }
  0x16   :  { %p3625_p9 = pnand %p3624_p8, %p3618_p5 }
  0x18   :  { %3628 = shalt.err (!%p3625_p9)
}
  0x19   :  { %s3721_s11 = smov 128   ;;  %s3722_s12 = smov 8  }
  0x1a   :  { %59 = dma.hbm_to_vmem [thread:$0]  %s3870_s3, 8192, %s54_s9, [#allocation9], %s3721_s11, %s3721_s11, %s3722_s12  }
  0x1b   :  { %s3723_s15 = smov [#allocation2]   ;;  %s3724_s17 = smov [#allocation7]  }
  0x1c   :  { %s22_s16 = sshll.u32 %s3723_s15, 4  ;;  %s44_s1 = sshll.u32 %s3724_s17, 4  ;;  %s23_s16 = int_to_ptr.vmem [resolvable:$true] %s22_s16  ;;  %s45_s1 = int_to_ptr.vmem [resolvable:$true] %s44_s1 }
  0x1d   :  { %s3637_s18 = scalar_lea.vmem %s23_s16, 128  ;;  %p3642_p11 = scmp.lt.s32.totalorder %s23_s16, %s23_s16 }
  0x1e   :  { %p3638_p10 = scmp.ne.s32.totalorder %s23_s16, %s3637_s18  ;;  %p3643_p12 = scmp.lt.s32.totalorder %s3637_s18, %s3637_s18 }
  0x20   :  { %p3644_p13 = por %p3643_p12, %p3642_p11 }
  0x22   :  { %p3645_p0 = pnand %p3644_p13, %p3638_p10 }
  0x24   :  { %3648 = shalt.err (!%p3645_p0)
}
  0x25   :  { %25 = dma.hbm_to_vmem [thread:$0]  %s3867_s0, 128, %s23_s16, [#allocation3]  }
  0x26   :  { %s3657_s21 = scalar_lea.vmem %s45_s1, 64  ;;  %p3662_p2 = scmp.lt.s32.totalorder %s45_s1, %s45_s1 }
  0x27   :  { %p3658_p1 = scmp.ne.s32.totalorder %s45_s1, %s3657_s21  ;;  %p3663_p3 = scmp.lt.s32.totalorder %s3657_s21, %s3657_s21 }
  0x29   :  { %p3664_p4 = por %p3663_p3, %p3662_p2 }
  0x2b   :  { %p3665_p5 = pnand %p3664_p4, %p3658_p1 }
  0x2d   :  { %3668 = shalt.err (!%p3665_p5)
}
  0x2e   :  { %47 = dma.hbm_to_vmem [thread:$0]  %s3869_s2, 64, %s45_s1, [#allocation6]  }
  0x2f   :  { %s3725_s23 = smov [#allocation10]  }
  0x30   :  { %s67_s24 = sshll.u32 %s3725_s23, 4  ;;  %s68_s24 = int_to_ptr.vmem [resolvable:$true] %s67_s24 }
  0x31   :  { %s3677_s25 = scalar_lea.vmem %s68_s24, 2048  ;;  %p3682_p7 = scmp.lt.s32.totalorder %s68_s24, %s68_s24 }
  0x32   :  { %p3678_p6 = scmp.ne.s32.totalorder %s68_s24, %s3677_s25  ;;  %p3683_p8 = scmp.lt.s32.totalorder %s3677_s25, %s3677_s25 }
  0x34   :  { %p3684_p9 = por %p3683_p8, %p3682_p7 }
  0x36   :  { %p3685_p10 = pnand %p3684_p9, %p3678_p6 }
  0x38   :  { %3688 = shalt.err (!%p3685_p10)
}
  0x39   :  { %s3726_s0 = smov 64   ;;  %s3727_s26 = smov 4  }
  0x3a   :  { %73 = dma.hbm_to_vmem [thread:$0]  %s3872_s5, 2048, %s68_s24, [#allocation9], %s3726_s0, %s3726_s0, %s3727_s26  }
  0x3b   :  { %3709 = dma.done.wait [#allocation3], 128  }
  0x3c   :  { %3710 = vsyncadd [#allocation3], 4294967168 }
  0x3d   :  { %3711 = dma.done.wait [#allocation6], 32832  }
  0x3e   :  { %3712 = vsyncadd [#allocation6], 4294934464 }
  0x3f   :  { %3713 = dma.done.wait [#allocation9], 10240  }
  0x40   :  { %3714 = vsyncadd [#allocation9], 4294957056  ;;  %v3092_v0 = vld [vmem:[#allocation5 + $0xe4] ss:$16 sps:$4 sm:$0xff]   ;;  %v3096_v2 = vld [vmem:[#allocation5 + $0xe0] ss:$16 sps:$4 sm:$0xff]   ;;  %v351_v36 = vlaneseq }
  0x41   :  { %v3094_v1 = vld [vmem:[#allocation5 + $0x2e4] ss:$16 sps:$4 sm:$0xff]   ;;  %1709 = vmatprep.subr.bf16.mxu0 %v3092_v0  ;;  %v3097_v3 = vld [vmem:[#allocation5 + $0x2e0] ss:$16 sps:$4 sm:$0xff]   ;;  %v3728_v37 = vmov 1966171168  }
  0x42   :  { %1750 = vmatprep.subr.bf16.mxu1 %v3094_v1  ;;  %v3098_v4 = vld [vmem:[#allocation5 + $0xc4] ss:$16 sps:$4 sm:$0xff]   ;;  %1710 = vmatpush1.bf16.msra.mxu0 %v3096_v2  ;;  %v3102_v6 = vld [vmem:[#allocation5 + $0xc0] ss:$16 sps:$4 sm:$0xff]   ;;  %v374_v38 = vunpack.c.l.s4 %v3728_v37  ;;  %v3785_v42 = vshrl.u32 %v351_v36, 7  ;;  %v92_v52 = vld [vmem:[#allocation2] sm:$0xff] }
  0x43   :  { %1751 = vmatpush1.bf16.msra.mxu1 %v3097_v3  ;;  %v3100_v5 = vld [vmem:[#allocation5 + $0x2c4] ss:$16 sps:$4 sm:$0xff]   ;;  %1711 = vmatprep.subr.bf16.mxu0 %v3098_v4  ;;  %v3103_v7 = vld [vmem:[#allocation5 + $0x2c0] ss:$16 sps:$4 sm:$0xff]   ;;  %v372_v55 = vcombine.high %v92_v52, %v92_v52  ;;  %s3729_s30 = smov [#allocation11]  }
  0x44   :  { %1752 = vmatprep.subr.bf16.mxu1 %v3100_v5  ;;  %v3104_v8 = vld [vmem:[#allocation5 + $0xa4] ss:$16 sps:$4 sm:$0xff]   ;;  %v3108_v10 = vld [vmem:[#allocation5 + $0xa0] ss:$16 sps:$4 sm:$0xff]   ;;  %v375_v43 = vunpack.c.0.s8 %v374_v38  ;;  %s2709_s8 = sshll.u32 %s3729_s30, 4  ;;  %s2710_s8 = int_to_ptr.vmem [resolvable:$true] %s2709_s8 }
  0x45   :  { %v3106_v9 = vld [vmem:[#allocation5 + $0x2a4] ss:$16 sps:$4 sm:$0xff]   ;;  %v3109_v11 = vld [vmem:[#allocation5 + $0x2a0] ss:$16 sps:$4 sm:$0xff]   ;;  %s3689_s9 = scalar_lea.vmem %s2710_s8, 32  ;;  %p3694_p12 = scmp.lt.s32.totalorder %s2710_s8, %s2710_s8 }
  0x46   :  { %1712 = vmatpush1.bf16.msra.mxu0 %v3102_v6  ;;  %v3110_v12 = vld [vmem:[#allocation5 + $0x84] ss:$16 sps:$4 sm:$0xff]   ;;  %v3114_v14 = vld [vmem:[#allocation5 + $0x80] ss:$16 sps:$4 sm:$0xff]   ;;  %v378_v49 = vsub.s32 %v375_v43, %v3785_v42  ;;  %p3690_p11 = scmp.ne.s32.totalorder %s2710_s8, %s3689_s9  ;;  %p3695_p13 = scmp.lt.s32.totalorder %s3689_s9, %s3689_s9 }
  0x47   :  { %1753 = vmatpush1.bf16.msra.mxu1 %v3103_v7  ;;  %1713 = vmatprep.subr.bf16.mxu0 %v3104_v8  ;;  %v3112_v13 = vld [vmem:[#allocation5 + $0x284] ss:$16 sps:$4 sm:$0xff]   ;;  %v3115_v15 = vld [vmem:[#allocation5 + $0x280] ss:$16 sps:$4 sm:$0xff]  }
  0x48   :  { %1754 = vmatprep.subr.bf16.mxu1 %v3106_v9  ;;  %v3116_v16 = vld [vmem:[#allocation5 + $0x64] ss:$16 sps:$4 sm:$0xff]   ;;  %v3120_v18 = vld [vmem:[#allocation5 + $0x60] ss:$16 sps:$4 sm:$0xff]   ;;  %v379_v54 = vrot.slane %v92_v52, %v378_v49  ;;  %v386_v60 = vrot.slane %v372_v55, %v378_v49  ;;  %p3696_p0 = por %p3695_p13, %p3694_p12 }
  0x49   :  { %v3118_v17 = vld [vmem:[#allocation5 + $0x264] ss:$16 sps:$4 sm:$0xff]   ;;  %v3121_v19 = vld [vmem:[#allocation5 + $0x260] ss:$16 sps:$4 sm:$0xff]  }
  0x4a   :  { %1714 = vmatpush1.bf16.msra.mxu0 %v3108_v10  ;;  %v3122_v20 = vld [vmem:[#allocation5 + $0x44] ss:$16 sps:$4 sm:$0xff]   ;;  %v3126_v22 = vld [vmem:[#allocation5 + $0x40] ss:$16 sps:$4 sm:$0xff]   ;;  %v387_v59 = vcombine.high %v379_v54, %v379_v54  ;;  %v3790_v63 = vrot.slane %v386_v60, %v378_v49  ;;  %p3697_p1 = pnand %p3696_p0, %p3690_p11 }
  0x4b   :  { %1755 = vmatpush1.bf16.msra.mxu1 %v3109_v11  ;;  %1715 = vmatprep.subr.bf16.mxu0 %v3110_v12  ;;  %v3124_v21 = vld [vmem:[#allocation5 + $0x244] ss:$16 sps:$4 sm:$0xff]   ;;  %v3127_v23 = vld [vmem:[#allocation5 + $0x240] ss:$16 sps:$4 sm:$0xff]   ;;  %v388_v12 = vcombine.high %v386_v60, %v386_v60 }
  0x4c   :  { %1756 = vmatprep.subr.bf16.mxu1 %v3112_v13  ;;  %v3128_v24 = vld [vmem:[#allocation5 + $0x24] ss:$16 sps:$4 sm:$0xff]   ;;  %v3132_v26 = vld [vmem:[#allocation5 + $0x20] ss:$16 sps:$4 sm:$0xff]   ;;  %v3788_v62 = vrot.slane %v387_v59, %v378_v49 }
  0x4d   :  { %v3130_v25 = vld [vmem:[#allocation5 + $0x224] ss:$16 sps:$4 sm:$0xff]   ;;  %v3133_v27 = vld [vmem:[#allocation5 + $0x220] ss:$16 sps:$4 sm:$0xff]  }
  0x4e   :  { %1716 = vmatpush1.bf16.msra.mxu0 %v3114_v14  ;;  %v3134_v28 = vld [vmem:[#allocation5 + $0x4] ss:$16 sps:$4 sm:$0xff]   ;;  %v3138_v30 = vld [vmem:[#allocation5] ss:$16 sps:$4 sm:$0xff]   ;;  %v3794_v3 = vcombine.high %v3788_v62, %v3788_v62  ;;  %1741 = vmatprep.mubr.bf16.mxu0 %v3788_v62  ;;  %v3798_v14 = vrot.slane %v379_v54, %v378_v49 }
  0x4f   :  { %1757 = vmatpush1.bf16.msra.mxu1 %v3115_v15  ;;  %1717 = vmatprep.subr.bf16.mxu0 %v3116_v16  ;;  %v3136_v29 = vld [vmem:[#allocation5 + $0x204] ss:$16 sps:$4 sm:$0xff]   ;;  %v3139_v31 = vld [vmem:[#allocation5 + $0x200] ss:$16 sps:$4 sm:$0xff]  }
  0x50   :  { %1758 = vmatprep.subr.bf16.mxu1 %v3118_v17  ;;  %v3140_v32 = vld [vmem:[#allocation5 + $0x1e4] ss:$16 sps:$4 sm:$0xff]   ;;  %v3144_v34 = vld [vmem:[#allocation5 + $0x1e0] ss:$16 sps:$4 sm:$0xff]   ;;  %1782 = vmatprep.mubr.bf16.mxu1 %v3794_v3 }
  0x51   :  { %v3142_v33 = vld [vmem:[#allocation5 + $0x3e4] ss:$16 sps:$4 sm:$0xff]   ;;  %v3145_v35 = vld [vmem:[#allocation5 + $0x3e0] ss:$16 sps:$4 sm:$0xff]  }
  0x52   :  { %1718 = vmatpush1.bf16.msra.mxu0 %v3120_v18  ;;  %v3146_v39 = vld [vmem:[#allocation5 + $0x1c4] ss:$16 sps:$4 sm:$0xff]   ;;  %v3150_v41 = vld [vmem:[#allocation5 + $0x1c0] ss:$16 sps:$4 sm:$0xff]   ;;  %v3800_v18 = vrot.slane %v388_v12, %v378_v49 }
  0x53   :  { %1759 = vmatpush1.bf16.msra.mxu1 %v3121_v19  ;;  %1719 = vmatprep.subr.bf16.mxu0 %v3122_v20  ;;  %v3148_v40 = vld [vmem:[#allocation5 + $0x3c4] ss:$16 sps:$4 sm:$0xff]   ;;  %v3151_v44 = vld [vmem:[#allocation5 + $0x3c0] ss:$16 sps:$4 sm:$0xff]   ;;  %v3804_v19 = vcombine.high %v3798_v14, %v3798_v14 }
  0x54   :  { %1760 = vmatprep.subr.bf16.mxu1 %v3124_v21  ;;  %v3152_v45 = vld [vmem:[#allocation5 + $0x1a4] ss:$16 sps:$4 sm:$0xff]   ;;  %v3156_v47 = vld [vmem:[#allocation5 + $0x1a0] ss:$16 sps:$4 sm:$0xff]  }
  0x55   :  { %v3154_v46 = vld [vmem:[#allocation5 + $0x3a4] ss:$16 sps:$4 sm:$0xff]   ;;  %v3157_v48 = vld [vmem:[#allocation5 + $0x3a0] ss:$16 sps:$4 sm:$0xff]  }
  0x56   :  { %1720 = vmatpush1.bf16.msra.mxu0 %v3126_v22  ;;  %v3158_v50 = vld [vmem:[#allocation5 + $0x184] ss:$16 sps:$4 sm:$0xff]   ;;  %v3162_v53 = vld [vmem:[#allocation5 + $0x180] ss:$16 sps:$4 sm:$0xff]  }
  0x57   :  { %1761 = vmatpush1.bf16.msra.mxu1 %v3127_v23  ;;  %1721 = vmatprep.subr.bf16.mxu0 %v3128_v24  ;;  %v3160_v51 = vld [vmem:[#allocation5 + $0x384] ss:$16 sps:$4 sm:$0xff]   ;;  %v3163_v56 = vld [vmem:[#allocation5 + $0x380] ss:$16 sps:$4 sm:$0xff]   ;;  %v3808_v24 = vcombine.high %v3800_v18, %v3800_v18 }
  0x58   :  { %1762 = vmatprep.subr.bf16.mxu1 %v3130_v25  ;;  %v3164_v57 = vld [vmem:[#allocation5 + $0x164] ss:$16 sps:$4 sm:$0xff]   ;;  %v3168_v61 = vld [vmem:[#allocation5 + $0x160] ss:$16 sps:$4 sm:$0xff]  }
  0x59   :  { %v3166_v58 = vld [vmem:[#allocation5 + $0x364] ss:$16 sps:$4 sm:$0xff]   ;;  %v3169_v0 = vld [vmem:[#allocation5 + $0x360] ss:$16 sps:$4 sm:$0xff]  }
  0x5a   :  { %1722 = vmatpush1.bf16.msra.mxu0 %v3132_v26  ;;  %v3170_v1 = vld [vmem:[#allocation5 + $0x144] ss:$16 sps:$4 sm:$0xff]   ;;  %v3174_v4 = vld [vmem:[#allocation5 + $0x140] ss:$16 sps:$4 sm:$0xff]  }
  0x5b   :  { %1763 = vmatpush1.bf16.msra.mxu1 %v3133_v27  ;;  %1723 = vmatprep.subr.bf16.mxu0 %v3134_v28  ;;  %v3172_v2 = vld [vmem:[#allocation5 + $0x344] ss:$16 sps:$4 sm:$0xff]   ;;  %v3175_v5 = vld [vmem:[#allocation5 + $0x340] ss:$16 sps:$4 sm:$0xff]  }
  0x5c   :  { %1764 = vmatprep.subr.bf16.mxu1 %v3136_v29  ;;  %v3176_v6 = vld [vmem:[#allocation5 + $0x124] ss:$16 sps:$4 sm:$0xff]   ;;  %v3180_v8 = vld [vmem:[#allocation5 + $0x120] ss:$16 sps:$4 sm:$0xff]  }
  0x5d   :  { %v3178_v7 = vld [vmem:[#allocation5 + $0x324] ss:$16 sps:$4 sm:$0xff]   ;;  %v3181_v9 = vld [vmem:[#allocation5 + $0x320] ss:$16 sps:$4 sm:$0xff]  }
  0x5e   :  { %1724 = vmatpush1.bf16.msra.mxu0 %v3138_v30  ;;  %v3182_v10 = vld [vmem:[#allocation5 + $0x104] ss:$16 sps:$4 sm:$0xff]   ;;  %v3186_v13 = vld [vmem:[#allocation5 + $0x100] ss:$16 sps:$4 sm:$0xff]  }
  0x5f   :  { %1765 = vmatpush1.bf16.msra.mxu1 %v3139_v31  ;;  %1725 = vmatprep.subr.bf16.mxu0 %v3140_v32  ;;  %v3184_v11 = vld [vmem:[#allocation5 + $0x304] ss:$16 sps:$4 sm:$0xff]   ;;  %v3187_v15 = vld [vmem:[#allocation5 + $0x300] ss:$16 sps:$4 sm:$0xff]  }
  0x60   :  { %1766 = vmatprep.subr.bf16.mxu1 %v3142_v33  ;;  %v3190_v16 = vld [vmem:[#allocation5 + $0x4e4] ss:$16 sps:$4 sm:$0xff]   ;;  %v3188_v20 = vld [vmem:[#allocation5 + $0x4e0] ss:$16 sps:$4 sm:$0xff]  }
  0x61   :  { %v3193_v17 = vld [vmem:[#allocation5 + $0x6e4] ss:$16 sps:$4 sm:$0xff]   ;;  %v3191_v21 = vld [vmem:[#allocation5 + $0x6e0] ss:$16 sps:$4 sm:$0xff]  }
  0x62   :  { %1726 = vmatpush2.bf16.msra.mxu0 %v3144_v34  ;;  %v3196_v22 = vld [vmem:[#allocation5 + $0x4c4] ss:$16 sps:$4 sm:$0xff]   ;;  %v3194_v25 = vld [vmem:[#allocation5 + $0x4c0] ss:$16 sps:$4 sm:$0xff]  }
  0x63   :  { %1767 = vmatpush2.bf16.msra.mxu1 %v3145_v35  ;;  %1727 = vmatprep.subr.bf16.mxu0 %v3146_v39  ;;  %v3199_v23 = vld [vmem:[#allocation5 + $0x6c4] ss:$16 sps:$4 sm:$0xff]   ;;  %v3197_v26 = vld [vmem:[#allocation5 + $0x6c0] ss:$16 sps:$4 sm:$0xff]  }
  0x64   :  { %1768 = vmatprep.subr.bf16.mxu1 %v3148_v40  ;;  %v3202_v27 = vld [vmem:[#allocation5 + $0x4a4] ss:$16 sps:$4 sm:$0xff]   ;;  %v3200_v29 = vld [vmem:[#allocation5 + $0x4a0] ss:$16 sps:$4 sm:$0xff]  }
  0x65   :  { %v3205_v28 = vld [vmem:[#allocation5 + $0x6a4] ss:$16 sps:$4 sm:$0xff]   ;;  %v3203_v30 = vld [vmem:[#allocation5 + $0x6a0] ss:$16 sps:$4 sm:$0xff]  }
  0x66   :  { %1728 = vmatpush2.bf16.msra.mxu0 %v3150_v41  ;;  %v3208_v31 = vld [vmem:[#allocation5 + $0x484] ss:$16 sps:$4 sm:$0xff]   ;;  %v3206_v33 = vld [vmem:[#allocation5 + $0x480] ss:$16 sps:$4 sm:$0xff]  }
  0x67   :  { %1769 = vmatpush2.bf16.msra.mxu1 %v3151_v44  ;;  %1729 = vmatprep.subr.bf16.mxu0 %v3152_v45  ;;  %v3211_v32 = vld [vmem:[#allocation5 + $0x684] ss:$16 sps:$4 sm:$0xff]   ;;  %v3209_v34 = vld [vmem:[#allocation5 + $0x680] ss:$16 sps:$4 sm:$0xff]  }
  0x68   :  { %1770 = vmatprep.subr.bf16.mxu1 %v3154_v46  ;;  %v3214_v35 = vld [vmem:[#allocation5 + $0x464] ss:$16 sps:$4 sm:$0xff]   ;;  %v3212_v37 = vld [vmem:[#allocation5 + $0x460] ss:$16 sps:$4 sm:$0xff]  }
  0x69   :  { %v3217_v36 = vld [vmem:[#allocation5 + $0x664] ss:$16 sps:$4 sm:$0xff]   ;;  %v3215_v38 = vld [vmem:[#allocation5 + $0x660] ss:$16 sps:$4 sm:$0xff]  }
  0x6a   :  { %1730 = vmatpush2.bf16.msra.mxu0 %v3156_v47  ;;  %v3220_v39 = vld [vmem:[#allocation5 + $0x444] ss:$16 sps:$4 sm:$0xff]   ;;  %v3218_v41 = vld [vmem:[#allocation5 + $0x440] ss:$16 sps:$4 sm:$0xff]  }
  0x6b   :  { %1771 = vmatpush2.bf16.msra.mxu1 %v3157_v48  ;;  %1731 = vmatprep.subr.bf16.mxu0 %v3158_v50  ;;  %v3223_v40 = vld [vmem:[#allocation5 + $0x644] ss:$16 sps:$4 sm:$0xff]   ;;  %v3221_v43 = vld [vmem:[#allocation5 + $0x640] ss:$16 sps:$4 sm:$0xff]  }
  0x6c   :  { %1772 = vmatprep.subr.bf16.mxu1 %v3160_v51  ;;  %v3226_v44 = vld [vmem:[#allocation5 + $0x424] ss:$16 sps:$4 sm:$0xff]   ;;  %v3224_v46 = vld [vmem:[#allocation5 + $0x420] ss:$16 sps:$4 sm:$0xff]  }
  0x6d   :  { %v3229_v45 = vld [vmem:[#allocation5 + $0x624] ss:$16 sps:$4 sm:$0xff]   ;;  %v3227_v47 = vld [vmem:[#allocation5 + $0x620] ss:$16 sps:$4 sm:$0xff]  }
  0x6e   :  { %1732 = vmatpush2.bf16.msra.mxu0 %v3162_v53  ;;  %v3232_v48 = vld [vmem:[#allocation5 + $0x404] ss:$16 sps:$4 sm:$0xff]   ;;  %v3230_v50 = vld [vmem:[#allocation5 + $0x400] ss:$16 sps:$4 sm:$0xff]  }
  0x6f   :  { %1773 = vmatpush2.bf16.msra.mxu1 %v3163_v56  ;;  %1733 = vmatprep.subr.bf16.mxu0 %v3164_v57  ;;  %v3235_v49 = vld [vmem:[#allocation5 + $0x604] ss:$16 sps:$4 sm:$0xff]   ;;  %v3233_v51 = vld [vmem:[#allocation5 + $0x600] ss:$16 sps:$4 sm:$0xff]  }
  0x70   :  { %1774 = vmatprep.subr.bf16.mxu1 %v3166_v58  ;;  %v3238_v52 = vld [vmem:[#allocation5 + $0x5e4] ss:$16 sps:$4 sm:$0xff]   ;;  %v3236_v54 = vld [vmem:[#allocation5 + $0x5e0] ss:$16 sps:$4 sm:$0xff]  }
  0x71   :  { %v3241_v53 = vld [vmem:[#allocation5 + $0x7e4] ss:$16 sps:$4 sm:$0xff]   ;;  %v3239_v55 = vld [vmem:[#allocation5 + $0x7e0] ss:$16 sps:$4 sm:$0xff]  }
  0x72   :  { %1734 = vmatpush2.bf16.msra.mxu0 %v3168_v61  ;;  %v3244_v56 = vld [vmem:[#allocation5 + $0x5c4] ss:$16 sps:$4 sm:$0xff]   ;;  %v3242_v58 = vld [vmem:[#allocation5 + $0x5c0] ss:$16 sps:$4 sm:$0xff]  }
  0x73   :  { %1775 = vmatpush2.bf16.msra.mxu1 %v3169_v0  ;;  %1735 = vmatprep.subr.bf16.mxu0 %v3170_v1  ;;  %v3247_v57 = vld [vmem:[#allocation5 + $0x7c4] ss:$16 sps:$4 sm:$0xff]   ;;  %v3245_v59 = vld [vmem:[#allocation5 + $0x7c0] ss:$16 sps:$4 sm:$0xff]  }
  0x74   :  { %1776 = vmatprep.subr.bf16.mxu1 %v3172_v2  ;;  %v3250_v60 = vld [vmem:[#allocation5 + $0x5a4] ss:$16 sps:$4 sm:$0xff]   ;;  %v3248_v0 = vld [vmem:[#allocation5 + $0x5a0] ss:$16 sps:$4 sm:$0xff]  }
  0x75   :  { %v3253_v61 = vld [vmem:[#allocation5 + $0x7a4] ss:$16 sps:$4 sm:$0xff]   ;;  %v3251_v1 = vld [vmem:[#allocation5 + $0x7a0] ss:$16 sps:$4 sm:$0xff]  }
  0x76   :  { %1736 = vmatpush2.bf16.msra.mxu0 %v3174_v4  ;;  %v3256_v2 = vld [vmem:[#allocation5 + $0x584] ss:$16 sps:$4 sm:$0xff]  }
  0x77   :  { %1777 = vmatpush2.bf16.msra.mxu1 %v3175_v5  ;;  %1737 = vmatprep.subr.bf16.mxu0 %v3176_v6  ;;  %v3259_v4 = vld [vmem:[#allocation5 + $0x784] ss:$16 sps:$4 sm:$0xff]   ;;  %v3254_v5 = vld [vmem:[#allocation5 + $0x580] ss:$16 sps:$4 sm:$0xff]  }
  0x78   :  { %1778 = vmatprep.subr.bf16.mxu1 %v3178_v7  ;;  %v3257_v6 = vld [vmem:[#allocation5 + $0x780] ss:$16 sps:$4 sm:$0xff]   ;;  %v3262_v7 = vld [vmem:[#allocation5 + $0x564] ss:$16 sps:$4 sm:$0xff]  }
  0x79   :  { %v3271_v12 = vld [vmem:[#allocation5 + $0x744] ss:$16 sps:$4 sm:$0xff]  }
  0x7a   :  { %1738 = vmatpush2.bf16.msra.mxu0 %v3180_v8  ;;  %v3265_v8 = vld [vmem:[#allocation5 + $0x764] ss:$16 sps:$4 sm:$0xff]  }
  0x7b   :  { %1779 = vmatpush2.bf16.msra.mxu1 %v3181_v9  ;;  %1739 = vmatprep.subr.bf16.mxu0 %v3182_v10  ;;  %v3260_v9 = vld [vmem:[#allocation5 + $0x560] ss:$16 sps:$4 sm:$0xff]  }
  0x7c   :  { %1780 = vmatprep.subr.bf16.mxu1 %v3184_v11  ;;  %v3263_v10 = vld [vmem:[#allocation5 + $0x760] ss:$16 sps:$4 sm:$0xff]   ;;  %v3268_v11 = vld [vmem:[#allocation5 + $0x544] ss:$16 sps:$4 sm:$0xff]  }
  0x7e   :  { %1740 = vmatpush2.bf16.msra.mxu0 %v3186_v13  ;;  %v3266_v13 = vld [vmem:[#allocation5 + $0x540] ss:$16 sps:$4 sm:$0xff]  }
  0x7f   :  { %1781 = vmatpush2.bf16.msra.mxu1 %v3187_v15  ;;  %1791 = vmatprep.subr.bf16.mxu0 %v3190_v16  ;;  %v3269_v15 = vld [vmem:[#allocation5 + $0x740] ss:$16 sps:$4 sm:$0xff]   ;;  %v3274_v16 = vld [vmem:[#allocation5 + $0x524] ss:$16 sps:$4 sm:$0xff]  }
  0x80   :  { %1832 = vmatprep.subr.bf16.mxu1 %v3193_v17  ;;  %v3277_v17 = vld [vmem:[#allocation5 + $0x724] ss:$16 sps:$4 sm:$0xff]  }
  0x81   :  { %1742 = vmatmul.mubr.bf16.vlgmr.msra.gmra.mxu0 %v3798_v14 }
  0x82   :  { %1783 = vmatmul.mubr.bf16.vlgmr.msra.gmra.mxu1 %v3804_v19  ;;  %1792 = vmatpush1.bf16.msra.mxu0 %v3188_v20  ;;  %v3272_v20 = vld [vmem:[#allocation5 + $0x520] ss:$16 sps:$4 sm:$0xff]  }
  0x83   :  { %1833 = vmatpush1.bf16.msra.mxu1 %v3191_v21  ;;  %1793 = vmatprep.subr.bf16.mxu0 %v3196_v22  ;;  %v3275_v21 = vld [vmem:[#allocation5 + $0x720] ss:$16 sps:$4 sm:$0xff]   ;;  %v3280_v22 = vld [vmem:[#allocation5 + $0x504] ss:$16 sps:$4 sm:$0xff]  }
  0x84   :  { %1834 = vmatprep.subr.bf16.mxu1 %v3199_v23  ;;  %1823 = vmatprep.mubr.bf16.mxu0 %v3800_v18  ;;  %v3283_v23 = vld [vmem:[#allocation5 + $0x704] ss:$16 sps:$4 sm:$0xff]  }
  0x85   :  { %1864 = vmatprep.mubr.bf16.mxu1 %v3808_v24 }
  0x86   :  { %1794 = vmatpush1.bf16.msra.mxu0 %v3194_v25  ;;  %v3278_v25 = vld [vmem:[#allocation5 + $0x500] ss:$16 sps:$4 sm:$0xff]  }
  0x87   :  { %1835 = vmatpush1.bf16.msra.mxu1 %v3197_v26  ;;  %1795 = vmatprep.subr.bf16.mxu0 %v3202_v27  ;;  %v3281_v26 = vld [vmem:[#allocation5 + $0x700] ss:$16 sps:$4 sm:$0xff]   ;;  %v3287_v27 = vld [vmem:[#allocation5 + $0xec] ss:$16 sps:$4 sm:$0xff]  }
  0x88   :  { %1836 = vmatprep.subr.bf16.mxu1 %v3205_v28  ;;  %v3290_v28 = vld [vmem:[#allocation5 + $0x2ec] ss:$16 sps:$4 sm:$0xff]  }
  0x8a   :  { %1796 = vmatpush1.bf16.msra.mxu0 %v3200_v29  ;;  %v3816_v29 = vcombine.high %v3790_v63, %v3790_v63 }
  0x8b   :  { %1837 = vmatpush1.bf16.msra.mxu1 %v3203_v30  ;;  %1797 = vmatprep.subr.bf16.mxu0 %v3208_v31  ;;  %v3285_v30 = vld [vmem:[#allocation5 + $0xe8] ss:$16 sps:$4 sm:$0xff]  }
  0x8c   :  { %1838 = vmatprep.subr.bf16.mxu1 %v3211_v32  ;;  %v3288_v31 = vld [vmem:[#allocation5 + $0x2e8] ss:$16 sps:$4 sm:$0xff]   ;;  %v3293_v32 = vld [vmem:[#allocation5 + $0xcc] ss:$16 sps:$4 sm:$0xff]  }
  0x8e   :  { %1798 = vmatpush1.bf16.msra.mxu0 %v3206_v33  ;;  %v3296_v33 = vld [vmem:[#allocation5 + $0x2cc] ss:$16 sps:$4 sm:$0xff]  }
  0x8f   :  { %1839 = vmatpush1.bf16.msra.mxu1 %v3209_v34  ;;  %1799 = vmatprep.subr.bf16.mxu0 %v3214_v35  ;;  %v3291_v34 = vld [vmem:[#allocation5 + $0xc8] ss:$16 sps:$4 sm:$0xff]  }
  0x90   :  { %1840 = vmatprep.subr.bf16.mxu1 %v3217_v36  ;;  %v3294_v35 = vld [vmem:[#allocation5 + $0x2c8] ss:$16 sps:$4 sm:$0xff]   ;;  %v3299_v36 = vld [vmem:[#allocation5 + $0xac] ss:$16 sps:$4 sm:$0xff]  }
  0x92   :  { %1800 = vmatpush1.bf16.msra.mxu0 %v3212_v37  ;;  %v3302_v37 = vld [vmem:[#allocation5 + $0x2ac] ss:$16 sps:$4 sm:$0xff]  }
  0x93   :  { %1841 = vmatpush1.bf16.msra.mxu1 %v3215_v38  ;;  %1801 = vmatprep.subr.bf16.mxu0 %v3220_v39  ;;  %v3297_v38 = vld [vmem:[#allocation5 + $0xa8] ss:$16 sps:$4 sm:$0xff]  }
  0x94   :  { %1842 = vmatprep.subr.bf16.mxu1 %v3223_v40  ;;  %v3300_v39 = vld [vmem:[#allocation5 + $0x2a8] ss:$16 sps:$4 sm:$0xff]   ;;  %v3305_v40 = vld [vmem:[#allocation5 + $0x8c] ss:$16 sps:$4 sm:$0xff]  }
  0x96   :  { %1802 = vmatpush1.bf16.msra.mxu0 %v3218_v41  ;;  %v3308_v41 = vld [vmem:[#allocation5 + $0x28c] ss:$16 sps:$4 sm:$0xff]  }
  0x97   :  { %1843 = vmatpush1.bf16.msra.mxu1 %v3221_v43  ;;  %1803 = vmatprep.subr.bf16.mxu0 %v3226_v44  ;;  %v3303_v43 = vld [vmem:[#allocation5 + $0x88] ss:$16 sps:$4 sm:$0xff]  }
  0x98   :  { %1844 = vmatprep.subr.bf16.mxu1 %v3229_v45  ;;  %v3306_v44 = vld [vmem:[#allocation5 + $0x288] ss:$16 sps:$4 sm:$0xff]   ;;  %v3311_v45 = vld [vmem:[#allocation5 + $0x6c] ss:$16 sps:$4 sm:$0xff]  }
  0x9a   :  { %1804 = vmatpush1.bf16.msra.mxu0 %v3224_v46  ;;  %v3314_v46 = vld [vmem:[#allocation5 + $0x26c] ss:$16 sps:$4 sm:$0xff]  }
  0x9b   :  { %1845 = vmatpush1.bf16.msra.mxu1 %v3227_v47  ;;  %1805 = vmatprep.subr.bf16.mxu0 %v3232_v48  ;;  %v3309_v47 = vld [vmem:[#allocation5 + $0x68] ss:$16 sps:$4 sm:$0xff]   ;;  %v3320_v48 = vld [vmem:[#allocation5 + $0x24c] ss:$16 sps:$4 sm:$0xff]  }
  0x9c   :  { %1846 = vmatprep.subr.bf16.mxu1 %v3235_v49  ;;  %v3315_v49 = vld [vmem:[#allocation5 + $0x48] ss:$16 sps:$4 sm:$0xff]  }
  0x9e   :  { %1806 = vmatpush1.bf16.msra.mxu0 %v3230_v50  ;;  %v3318_v50 = vld [vmem:[#allocation5 + $0x248] ss:$16 sps:$4 sm:$0xff]  }
  0x9f   :  { %1847 = vmatpush1.bf16.msra.mxu1 %v3233_v51  ;;  %1807 = vmatprep.subr.bf16.mxu0 %v3238_v52  ;;  %v3323_v51 = vld [vmem:[#allocation5 + $0x2c] ss:$16 sps:$4 sm:$0xff]  }
  0xa0   :  { %1848 = vmatprep.subr.bf16.mxu1 %v3241_v53  ;;  %v3326_v52 = vld [vmem:[#allocation5 + $0x22c] ss:$16 sps:$4 sm:$0xff]   ;;  %v3321_v53 = vld [vmem:[#allocation5 + $0x28] ss:$16 sps:$4 sm:$0xff]  }
  0xa2   :  { %1808 = vmatpush2.bf16.msra.mxu0 %v3236_v54  ;;  %v3324_v54 = vld [vmem:[#allocation5 + $0x228] ss:$16 sps:$4 sm:$0xff]  }
  0xa3   :  { %1849 = vmatpush2.bf16.msra.mxu1 %v3239_v55  ;;  %1809 = vmatprep.subr.bf16.mxu0 %v3244_v56  ;;  %v3329_v55 = vld [vmem:[#allocation5 + $0xc] ss:$16 sps:$4 sm:$0xff]  }
  0xa4   :  { %1850 = vmatprep.subr.bf16.mxu1 %v3247_v57  ;;  %v3332_v56 = vld [vmem:[#allocation5 + $0x20c] ss:$16 sps:$4 sm:$0xff]   ;;  %v3327_v57 = vld [vmem:[#allocation5 + $0x8] ss:$16 sps:$4 sm:$0xff]  }
  0xa6   :  { %1810 = vmatpush2.bf16.msra.mxu0 %v3242_v58  ;;  %v3330_v58 = vld [vmem:[#allocation5 + $0x208] ss:$16 sps:$4 sm:$0xff]  }
  0xa7   :  { %1851 = vmatpush2.bf16.msra.mxu1 %v3245_v59  ;;  %1811 = vmatprep.subr.bf16.mxu0 %v3250_v60  ;;  %v3335_v59 = vld [vmem:[#allocation5 + $0x1ec] ss:$16 sps:$4 sm:$0xff]  }
  0xa8   :  { %1852 = vmatprep.subr.bf16.mxu1 %v3253_v61  ;;  %v3338_v60 = vld [vmem:[#allocation5 + $0x3ec] ss:$16 sps:$4 sm:$0xff]   ;;  %v3333_v61 = vld [vmem:[#allocation5 + $0x1e8] ss:$16 sps:$4 sm:$0xff]  }
  0xaa   :  { %1812 = vmatpush2.bf16.msra.mxu0 %v3248_v0  ;;  %v3336_v0 = vld [vmem:[#allocation5 + $0x3e8] ss:$16 sps:$4 sm:$0xff]  }
  0xab   :  { %1853 = vmatpush2.bf16.msra.mxu1 %v3251_v1  ;;  %1813 = vmatprep.subr.bf16.mxu0 %v3256_v2  ;;  %v3341_v1 = vld [vmem:[#allocation5 + $0x1cc] ss:$16 sps:$4 sm:$0xff]  }
  0xac   :  { %1854 = vmatprep.subr.bf16.mxu1 %v3259_v4  ;;  %v3344_v2 = vld [vmem:[#allocation5 + $0x3cc] ss:$16 sps:$4 sm:$0xff]   ;;  %v3339_v4 = vld [vmem:[#allocation5 + $0x1c8] ss:$16 sps:$4 sm:$0xff]  }
  0xae   :  { %1814 = vmatpush2.bf16.msra.mxu0 %v3254_v5  ;;  %v3342_v5 = vld [vmem:[#allocation5 + $0x3c8] ss:$16 sps:$4 sm:$0xff]  }
  0xaf   :  { %1855 = vmatpush2.bf16.msra.mxu1 %v3257_v6  ;;  %1815 = vmatprep.subr.bf16.mxu0 %v3262_v7  ;;  %v3347_v6 = vld [vmem:[#allocation5 + $0x1ac] ss:$16 sps:$4 sm:$0xff]  }
  0xb0   :  { %1856 = vmatprep.subr.bf16.mxu1 %v3265_v8  ;;  %v3350_v7 = vld [vmem:[#allocation5 + $0x3ac] ss:$16 sps:$4 sm:$0xff]   ;;  %v3345_v8 = vld [vmem:[#allocation5 + $0x1a8] ss:$16 sps:$4 sm:$0xff]  }
  0xb2   :  { %1816 = vmatpush2.bf16.msra.mxu0 %v3260_v9  ;;  %v3348_v9 = vld [vmem:[#allocation5 + $0x3a8] ss:$16 sps:$4 sm:$0xff]  }
  0xb3   :  { %1857 = vmatpush2.bf16.msra.mxu1 %v3263_v10  ;;  %1817 = vmatprep.subr.bf16.mxu0 %v3268_v11  ;;  %v3353_v10 = vld [vmem:[#allocation5 + $0x18c] ss:$16 sps:$4 sm:$0xff]  }
  0xb4   :  { %1858 = vmatprep.subr.bf16.mxu1 %v3271_v12  ;;  %v3356_v11 = vld [vmem:[#allocation5 + $0x38c] ss:$16 sps:$4 sm:$0xff]   ;;  %v3351_v12 = vld [vmem:[#allocation5 + $0x188] ss:$16 sps:$4 sm:$0xff]  }
  0xb6   :  { %1818 = vmatpush2.bf16.msra.mxu0 %v3266_v13  ;;  %v3354_v13 = vld [vmem:[#allocation5 + $0x388] ss:$16 sps:$4 sm:$0xff]  }
  0xb7   :  { %1859 = vmatpush2.bf16.msra.mxu1 %v3269_v15  ;;  %1819 = vmatprep.subr.bf16.mxu0 %v3274_v16  ;;  %v3359_v15 = vld [vmem:[#allocation5 + $0x16c] ss:$16 sps:$4 sm:$0xff]  }
  0xb8   :  { %1860 = vmatprep.subr.bf16.mxu1 %v3277_v17  ;;  %v3362_v16 = vld [vmem:[#allocation5 + $0x36c] ss:$16 sps:$4 sm:$0xff]   ;;  %v3357_v17 = vld [vmem:[#allocation5 + $0x168] ss:$16 sps:$4 sm:$0xff]  }
  0xba   :  { %1820 = vmatpush2.bf16.msra.mxu0 %v3272_v20  ;;  %v3360_v20 = vld [vmem:[#allocation5 + $0x368] ss:$16 sps:$4 sm:$0xff]  }
  0xbb   :  { %1861 = vmatpush2.bf16.msra.mxu1 %v3275_v21  ;;  %1821 = vmatprep.subr.bf16.mxu0 %v3280_v22  ;;  %v3365_v21 = vld [vmem:[#allocation5 + $0x14c] ss:$16 sps:$4 sm:$0xff]  }
  0xbc   :  { %1862 = vmatprep.subr.bf16.mxu1 %v3283_v23  ;;  %v3368_v22 = vld [vmem:[#allocation5 + $0x34c] ss:$16 sps:$4 sm:$0xff]   ;;  %v3363_v23 = vld [vmem:[#allocation5 + $0x148] ss:$16 sps:$4 sm:$0xff]  }
  0xbe   :  { %1822 = vmatpush2.bf16.msra.mxu0 %v3278_v25  ;;  %v3366_v25 = vld [vmem:[#allocation5 + $0x348] ss:$16 sps:$4 sm:$0xff]  }
  0xbf   :  { %1863 = vmatpush2.bf16.msra.mxu1 %v3281_v26  ;;  %1873 = vmatprep.subr.bf16.mxu0 %v3287_v27  ;;  %v3371_v26 = vld [vmem:[#allocation5 + $0x12c] ss:$16 sps:$4 sm:$0xff]  }
  0xc0   :  { %1914 = vmatprep.subr.bf16.mxu1 %v3290_v28  ;;  %v3374_v27 = vld [vmem:[#allocation5 + $0x32c] ss:$16 sps:$4 sm:$0xff]   ;;  %v3369_v28 = vld [vmem:[#allocation5 + $0x128] ss:$16 sps:$4 sm:$0xff]  }
  0xc1   :  { %1824 = vmatmul.mubr.bf16.vlgmr.msra.gmra.mxu0 %v3790_v63 }
  0xc2   :  { %1865 = vmatmul.mubr.bf16.vlgmr.msra.gmra.mxu1 %v3816_v29  ;;  %1874 = vmatpush1.bf16.msra.mxu0 %v3285_v30  ;;  %v3372_v30 = vld [vmem:[#allocation5 + $0x328] ss:$16 sps:$4 sm:$0xff]  }
  0xc3   :  { %1915 = vmatpush1.bf16.msra.mxu1 %v3288_v31  ;;  %1875 = vmatprep.subr.bf16.mxu0 %v3293_v32  ;;  %v3377_v31 = vld [vmem:[#allocation5 + $0x10c] ss:$16 sps:$4 sm:$0xff]  }
  0xc4   :  { %1916 = vmatprep.subr.bf16.mxu1 %v3296_v33  ;;  %1905 = vmatprep.mubr.bf16.mxu0 %v3788_v62  ;;  %v3312_v62 = vld [vmem:[#allocation5 + $0x268] ss:$16 sps:$4 sm:$0xff]   ;;  %v3380_v32 = vld [vmem:[#allocation5 + $0x30c] ss:$16 sps:$4 sm:$0xff]  }
  0xc5   :  { %1946 = vmatprep.mubr.bf16.mxu1 %v3794_v3  ;;  %v3317_v3 = vld [vmem:[#allocation5 + $0x4c] ss:$16 sps:$4 sm:$0xff]   ;;  %v3375_v33 = vld [vmem:[#allocation5 + $0x108] ss:$16 sps:$4 sm:$0xff]  }
  0xc6   :  { %1876 = vmatpush1.bf16.msra.mxu0 %v3291_v34  ;;  %v3378_v34 = vld [vmem:[#allocation5 + $0x308] ss:$16 sps:$4 sm:$0xff]  }
  0xc7   :  { %1917 = vmatpush1.bf16.msra.mxu1 %v3294_v35  ;;  %1877 = vmatprep.subr.bf16.mxu0 %v3299_v36  ;;  %v3383_v35 = vld [vmem:[#allocation5 + $0x4ec] ss:$16 sps:$4 sm:$0xff]  }
  0xc8   :  { %1918 = vmatprep.subr.bf16.mxu1 %v3302_v37  ;;  %v3386_v36 = vld [vmem:[#allocation5 + $0x6ec] ss:$16 sps:$4 sm:$0xff]   ;;  %v3381_v37 = vld [vmem:[#allocation5 + $0x4e8] ss:$16 sps:$4 sm:$0xff]  }
  0xca   :  { %1878 = vmatpush1.bf16.msra.mxu0 %v3297_v38  ;;  %v3384_v38 = vld [vmem:[#allocation5 + $0x6e8] ss:$16 sps:$4 sm:$0xff]  }
  0xcb   :  { %1919 = vmatpush1.bf16.msra.mxu1 %v3300_v39  ;;  %1879 = vmatprep.subr.bf16.mxu0 %v3305_v40  ;;  %v3389_v39 = vld [vmem:[#allocation5 + $0x4cc] ss:$16 sps:$4 sm:$0xff]  }
  0xcc   :  { %1920 = vmatprep.subr.bf16.mxu1 %v3308_v41  ;;  %v3392_v40 = vld [vmem:[#allocation5 + $0x6cc] ss:$16 sps:$4 sm:$0xff]   ;;  %v3387_v41 = vld [vmem:[#allocation5 + $0x4c8] ss:$16 sps:$4 sm:$0xff]  }
  0xce   :  { %1880 = vmatpush1.bf16.msra.mxu0 %v3303_v43  ;;  %v3390_v43 = vld [vmem:[#allocation5 + $0x6c8] ss:$16 sps:$4 sm:$0xff]  }
  0xcf   :  { %1921 = vmatpush1.bf16.msra.mxu1 %v3306_v44  ;;  %1881 = vmatprep.subr.bf16.mxu0 %v3311_v45  ;;  %v3395_v44 = vld [vmem:[#allocation5 + $0x4ac] ss:$16 sps:$4 sm:$0xff]  }
  0xd0   :  { %1922 = vmatprep.subr.bf16.mxu1 %v3314_v46  ;;  %v3398_v45 = vld [vmem:[#allocation5 + $0x6ac] ss:$16 sps:$4 sm:$0xff]   ;;  %v3393_v46 = vld [vmem:[#allocation5 + $0x4a8] ss:$16 sps:$4 sm:$0xff]  }
  0xd2   :  { %1882 = vmatpush1.bf16.msra.mxu0 %v3309_v47  ;;  %v3396_v47 = vld [vmem:[#allocation5 + $0x6a8] ss:$16 sps:$4 sm:$0xff]  }
  0xd3   :  { %1923 = vmatpush1.bf16.msra.mxu1 %v3312_v62  ;;  %1883 = vmatprep.subr.bf16.mxu0 %v3317_v3  ;;  %v3401_v62 = vld [vmem:[#allocation5 + $0x48c] ss:$16 sps:$4 sm:$0xff]   ;;  %v3399_v3 = vld [vmem:[#allocation5 + $0x488] ss:$16 sps:$4 sm:$0xff]  }
  0xd4   :  { %1924 = vmatprep.subr.bf16.mxu1 %v3320_v48  ;;  %v3407_v48 = vld [vmem:[#allocation5 + $0x46c] ss:$16 sps:$4 sm:$0xff]  }
  0xd6   :  { %1884 = vmatpush1.bf16.msra.mxu0 %v3315_v49  ;;  %v3410_v49 = vld [vmem:[#allocation5 + $0x66c] ss:$16 sps:$4 sm:$0xff]  }
  0xd7   :  { %1925 = vmatpush1.bf16.msra.mxu1 %v3318_v50  ;;  %1885 = vmatprep.subr.bf16.mxu0 %v3323_v51  ;;  %v3405_v50 = vld [vmem:[#allocation5 + $0x468] ss:$16 sps:$4 sm:$0xff]  }
  0xd8   :  { %1926 = vmatprep.subr.bf16.mxu1 %v3326_v52  ;;  %v3408_v51 = vld [vmem:[#allocation5 + $0x668] ss:$16 sps:$4 sm:$0xff]   ;;  %v3413_v52 = vld [vmem:[#allocation5 + $0x44c] ss:$16 sps:$4 sm:$0xff]  }
  0xda   :  { %1886 = vmatpush1.bf16.msra.mxu0 %v3321_v53  ;;  %v3414_v53 = vld [vmem:[#allocation5 + $0x648] ss:$16 sps:$4 sm:$0xff]  }
  0xdb   :  { %1927 = vmatpush1.bf16.msra.mxu1 %v3324_v54  ;;  %1887 = vmatprep.subr.bf16.mxu0 %v3329_v55  ;;  %v3419_v54 = vld [vmem:[#allocation5 + $0x42c] ss:$16 sps:$4 sm:$0xff]  }
  0xdc   :  { %1928 = vmatprep.subr.bf16.mxu1 %v3332_v56  ;;  %v3422_v55 = vld [vmem:[#allocation5 + $0x62c] ss:$16 sps:$4 sm:$0xff]   ;;  %v3417_v56 = vld [vmem:[#allocation5 + $0x428] ss:$16 sps:$4 sm:$0xff]  }
  0xde   :  { %1888 = vmatpush1.bf16.msra.mxu0 %v3327_v57  ;;  %v3420_v57 = vld [vmem:[#allocation5 + $0x628] ss:$16 sps:$4 sm:$0xff]  }
  0xdf   :  { %1929 = vmatpush1.bf16.msra.mxu1 %v3330_v58  ;;  %1889 = vmatprep.subr.bf16.mxu0 %v3335_v59  ;;  %v3425_v58 = vld [vmem:[#allocation5 + $0x40c] ss:$16 sps:$4 sm:$0xff]  }
  0xe0   :  { %1930 = vmatprep.subr.bf16.mxu1 %v3338_v60  ;;  %v3428_v59 = vld [vmem:[#allocation5 + $0x60c] ss:$16 sps:$4 sm:$0xff]   ;;  %v3423_v60 = vld [vmem:[#allocation5 + $0x408] ss:$16 sps:$4 sm:$0xff]  }
  0xe2   :  { %1890 = vmatpush2.bf16.msra.mxu0 %v3333_v61  ;;  %v3426_v61 = vld [vmem:[#allocation5 + $0x608] ss:$16 sps:$4 sm:$0xff]  }
  0xe3   :  { %1931 = vmatpush2.bf16.msra.mxu1 %v3336_v0  ;;  %1891 = vmatprep.subr.bf16.mxu0 %v3341_v1  ;;  %v3431_v0 = vld [vmem:[#allocation5 + $0x5ec] ss:$16 sps:$4 sm:$0xff]  }
  0xe4   :  { %1932 = vmatprep.subr.bf16.mxu1 %v3344_v2  ;;  %v3434_v1 = vld [vmem:[#allocation5 + $0x7ec] ss:$16 sps:$4 sm:$0xff]   ;;  %v3429_v2 = vld [vmem:[#allocation5 + $0x5e8] ss:$16 sps:$4 sm:$0xff]  }
  0xe6   :  { %1892 = vmatpush2.bf16.msra.mxu0 %v3339_v4  ;;  %v3432_v4 = vld [vmem:[#allocation5 + $0x7e8] ss:$16 sps:$4 sm:$0xff]  }
  0xe7   :  { %1933 = vmatpush2.bf16.msra.mxu1 %v3342_v5  ;;  %1893 = vmatprep.subr.bf16.mxu0 %v3347_v6  ;;  %v3437_v5 = vld [vmem:[#allocation5 + $0x5cc] ss:$16 sps:$4 sm:$0xff]  }
  0xe8   :  { %1934 = vmatprep.subr.bf16.mxu1 %v3350_v7  ;;  %v3440_v6 = vld [vmem:[#allocation5 + $0x7cc] ss:$16 sps:$4 sm:$0xff]   ;;  %v3435_v7 = vld [vmem:[#allocation5 + $0x5c8] ss:$16 sps:$4 sm:$0xff]  }
  0xea   :  { %1894 = vmatpush2.bf16.msra.mxu0 %v3345_v8  ;;  %v3438_v8 = vld [vmem:[#allocation5 + $0x7c8] ss:$16 sps:$4 sm:$0xff]  }
  0xeb   :  { %1935 = vmatpush2.bf16.msra.mxu1 %v3348_v9  ;;  %1895 = vmatprep.subr.bf16.mxu0 %v3353_v10  ;;  %v3443_v9 = vld [vmem:[#allocation5 + $0x5ac] ss:$16 sps:$4 sm:$0xff]  }
  0xec   :  { %1936 = vmatprep.subr.bf16.mxu1 %v3356_v11  ;;  %v3446_v10 = vld [vmem:[#allocation5 + $0x7ac] ss:$16 sps:$4 sm:$0xff]   ;;  %v3441_v11 = vld [vmem:[#allocation5 + $0x5a8] ss:$16 sps:$4 sm:$0xff]  }
  0xee   :  { %1896 = vmatpush2.bf16.msra.mxu0 %v3351_v12  ;;  %v3444_v12 = vld [vmem:[#allocation5 + $0x7a8] ss:$16 sps:$4 sm:$0xff]  }
  0xef   :  { %1937 = vmatpush2.bf16.msra.mxu1 %v3354_v13  ;;  %1897 = vmatprep.subr.bf16.mxu0 %v3359_v15  ;;  %v3449_v13 = vld [vmem:[#allocation5 + $0x58c] ss:$16 sps:$4 sm:$0xff]  }
  0xf0   :  { %1938 = vmatprep.subr.bf16.mxu1 %v3362_v16  ;;  %v3452_v15 = vld [vmem:[#allocation5 + $0x78c] ss:$16 sps:$4 sm:$0xff]   ;;  %v3447_v16 = vld [vmem:[#allocation5 + $0x588] ss:$16 sps:$4 sm:$0xff]  }
  0xf2   :  { %1898 = vmatpush2.bf16.msra.mxu0 %v3357_v17  ;;  %v3450_v17 = vld [vmem:[#allocation5 + $0x788] ss:$16 sps:$4 sm:$0xff]  }
  0xf3   :  { %1939 = vmatpush2.bf16.msra.mxu1 %v3360_v20  ;;  %1899 = vmatprep.subr.bf16.mxu0 %v3365_v21  ;;  %v3455_v20 = vld [vmem:[#allocation5 + $0x56c] ss:$16 sps:$4 sm:$0xff]  }
  0xf4   :  { %1940 = vmatprep.subr.bf16.mxu1 %v3368_v22  ;;  %v3458_v21 = vld [vmem:[#allocation5 + $0x76c] ss:$16 sps:$4 sm:$0xff]   ;;  %v3453_v22 = vld [vmem:[#allocation5 + $0x568] ss:$16 sps:$4 sm:$0xff]  }
  0xf6   :  { %1900 = vmatpush2.bf16.msra.mxu0 %v3363_v23  ;;  %v3456_v23 = vld [vmem:[#allocation5 + $0x768] ss:$16 sps:$4 sm:$0xff]  }
  0xf7   :  { %1941 = vmatpush2.bf16.msra.mxu1 %v3366_v25  ;;  %1901 = vmatprep.subr.bf16.mxu0 %v3371_v26  ;;  %v3461_v25 = vld [vmem:[#allocation5 + $0x54c] ss:$16 sps:$4 sm:$0xff]  }
  0xf8   :  { %1942 = vmatprep.subr.bf16.mxu1 %v3374_v27  ;;  %v3464_v26 = vld [vmem:[#allocation5 + $0x74c] ss:$16 sps:$4 sm:$0xff]   ;;  %v3459_v27 = vld [vmem:[#allocation5 + $0x548] ss:$16 sps:$4 sm:$0xff]  }
  0xfa   :  { %1902 = vmatpush2.bf16.msra.mxu0 %v3369_v28  ;;  %v3462_v28 = vld [vmem:[#allocation5 + $0x748] ss:$16 sps:$4 sm:$0xff]  }
  0xfb   :  { %1943 = vmatpush2.bf16.msra.mxu1 %v3372_v30  ;;  %1903 = vmatprep.subr.bf16.mxu0 %v3377_v31  ;;  %v3467_v30 = vld [vmem:[#allocation5 + $0x52c] ss:$16 sps:$4 sm:$0xff]  }
  0xfc   :  { %1944 = vmatprep.subr.bf16.mxu1 %v3380_v32  ;;  %v3470_v31 = vld [vmem:[#allocation5 + $0x72c] ss:$16 sps:$4 sm:$0xff]   ;;  %v3465_v32 = vld [vmem:[#allocation5 + $0x528] ss:$16 sps:$4 sm:$0xff]  }
  0xfe   :  { %1904 = vmatpush2.bf16.msra.mxu0 %v3375_v33  ;;  %v3468_v33 = vld [vmem:[#allocation5 + $0x728] ss:$16 sps:$4 sm:$0xff]  }
  0xff   :  { %1945 = vmatpush2.bf16.msra.mxu1 %v3378_v34  ;;  %1955 = vmatprep.subr.bf16.mxu0 %v3383_v35  ;;  %v3473_v34 = vld [vmem:[#allocation5 + $0x50c] ss:$16 sps:$4 sm:$0xff]  }
 0x100   :  { %1996 = vmatprep.subr.bf16.mxu1 %v3386_v36  ;;  %v3476_v35 = vld [vmem:[#allocation5 + $0x70c] ss:$16 sps:$4 sm:$0xff]   ;;  %v3471_v36 = vld [vmem:[#allocation5 + $0x508] ss:$16 sps:$4 sm:$0xff]  }
 0x101   :  { %1906 = vmatmul.mubr.bf16.vlgmr.msra.gmra.mxu0 %v3798_v14  ;;  %v3404_v14 = vld [vmem:[#allocation5 + $0x68c] ss:$16 sps:$4 sm:$0xff]  }
 0x102   :  { %1947 = vmatmul.mubr.bf16.vlgmr.msra.gmra.mxu1 %v3804_v19  ;;  %1956 = vmatpush1.bf16.msra.mxu0 %v3381_v37  ;;  %v3402_v19 = vld [vmem:[#allocation5 + $0x688] ss:$16 sps:$4 sm:$0xff]  }
 0x103   :  { %1997 = vmatpush1.bf16.msra.mxu1 %v3384_v38  ;;  %1957 = vmatprep.subr.bf16.mxu0 %v3389_v39  ;;  %v3474_v37 = vld [vmem:[#allocation5 + $0x708] ss:$16 sps:$4 sm:$0xff]   ;;  %v3477_v39 = vld [vmem:[#allocation8 + $0x70] ss:$8 sps:$4 sm:$0xff]  }
 0x104   :  { %1998 = vmatprep.subr.bf16.mxu1 %v3392_v40  ;;  %1987 = vmatprep.mubr.bf16.mxu0 %v3800_v18  ;;  %v3416_v18 = vld [vmem:[#allocation5 + $0x64c] ss:$16 sps:$4 sm:$0xff]   ;;  %v3479_v38 = vld [vmem:[#allocation8 + $0x74] ss:$8 sps:$4 sm:$0xff]   ;;  %v3482_v40 = vld [vmem:[#allocation8 + $0x64] ss:$8 sps:$4 sm:$0xff]  }
 0x105   :  { %2028 = vmatprep.mubr.bf16.mxu1 %v3808_v24  ;;  %v3411_v24 = vld [vmem:[#allocation5 + $0x448] ss:$16 sps:$4 sm:$0xff]  }
 0x106   :  { %1958 = vmatpush1.bf16.msra.mxu0 %v3387_v41 }
 0x107   :  { %1999 = vmatpush1.bf16.msra.mxu1 %v3390_v43  ;;  %1959 = vmatprep.subr.bf16.mxu0 %v3395_v44  ;;  %v3480_v44 = vld [vmem:[#allocation8 + $0x60] ss:$8 sps:$4 sm:$0xff]  }
 0x108   :  { %2000 = vmatprep.subr.bf16.mxu1 %v3398_v45 }
 0x10a   :  { %1960 = vmatpush1.bf16.msra.mxu0 %v3393_v46 }
 0x10b   :  { %2001 = vmatpush1.bf16.msra.mxu1 %v3396_v47  ;;  %1961 = vmatprep.subr.bf16.mxu0 %v3401_v62  ;;  %v3485_v47 = vld [vmem:[#allocation8 + $0x54] ss:$8 sps:$4 sm:$0xff]  }
 0x10c   :  { %2002 = vmatprep.subr.bf16.mxu1 %v3404_v14 }
 0x10e   :  { %1962 = vmatpush1.bf16.msra.mxu0 %v3399_v3  ;;  %v3483_v3 = vld [vmem:[#allocation8 + $0x50] ss:$8 sps:$4 sm:$0xff]  }
 0x10f   :  { %2003 = vmatpush1.bf16.msra.mxu1 %v3402_v19  ;;  %1963 = vmatprep.subr.bf16.mxu0 %v3407_v48 }
 0x110   :  { %2004 = vmatprep.subr.bf16.mxu1 %v3410_v49  ;;  %v3488_v49 = vld [vmem:[#allocation8 + $0x44] ss:$8 sps:$4 sm:$0xff]  }
 0x112   :  { %1964 = vmatpush1.bf16.msra.mxu0 %v3405_v50  ;;  %v3525_v50 = vld [vmem:[#allocation8 + $0x170] ss:$8 sps:$4 sm:$0xff]  }
 0x113   :  { %2005 = vmatpush1.bf16.msra.mxu1 %v3408_v51  ;;  %1965 = vmatprep.subr.bf16.mxu0 %v3413_v52  ;;  %v3530_v51 = vld [vmem:[#allocation8 + $0x164] ss:$8 sps:$4 sm:$0xff]   ;;  %v3528_v52 = vld [vmem:[#allocation8 + $0x160] ss:$8 sps:$4 sm:$0xff]  }
 0x114   :  { %2006 = vmatprep.subr.bf16.mxu1 %v3416_v18  ;;  %v3491_v18 = vld [vmem:[#allocation8 + $0x34] ss:$8 sps:$4 sm:$0xff]  }
 0x116   :  { %1966 = vmatpush1.bf16.msra.mxu0 %v3411_v24  ;;  %v3533_v24 = vld [vmem:[#allocation8 + $0x154] ss:$8 sps:$4 sm:$0xff]  }
 0x117   :  { %2007 = vmatpush1.bf16.msra.mxu1 %v3414_v53  ;;  %1967 = vmatprep.subr.bf16.mxu0 %v3419_v54  ;;  %v3489_v53 = vld [vmem:[#allocation8 + $0x30] ss:$8 sps:$4 sm:$0xff]  }
 0x118   :  { %2008 = vmatprep.subr.bf16.mxu1 %v3422_v55  ;;  %v3531_v54 = vld [vmem:[#allocation8 + $0x150] ss:$8 sps:$4 sm:$0xff]   ;;  %v3494_v55 = vld [vmem:[#allocation8 + $0x24] ss:$8 sps:$4 sm:$0xff]  }
 0x11a   :  { %1968 = vmatpush1.bf16.msra.mxu0 %v3417_v56  ;;  %v3536_v56 = vld [vmem:[#allocation8 + $0x144] ss:$8 sps:$4 sm:$0xff]  }
 0x11b   :  { %2009 = vmatpush1.bf16.msra.mxu1 %v3420_v57  ;;  %1969 = vmatprep.subr.bf16.mxu0 %v3425_v58  ;;  %v3492_v57 = vld [vmem:[#allocation8 + $0x20] ss:$8 sps:$4 sm:$0xff]  }
 0x11c   :  { %2010 = vmatprep.subr.bf16.mxu1 %v3428_v59  ;;  %v3534_v58 = vld [vmem:[#allocation8 + $0x140] ss:$8 sps:$4 sm:$0xff]   ;;  %v3497_v59 = vld [vmem:[#allocation8 + $0x14] ss:$8 sps:$4 sm:$0xff]  }
 0x11e   :  { %1970 = vmatpush1.bf16.msra.mxu0 %v3423_v60  ;;  %v3539_v60 = vld [vmem:[#allocation8 + $0x134] ss:$8 sps:$4 sm:$0xff]  }
 0x11f   :  { %2011 = vmatpush1.bf16.msra.mxu1 %v3426_v61  ;;  %1971 = vmatprep.subr.bf16.mxu0 %v3431_v0  ;;  %v3495_v61 = vld [vmem:[#allocation8 + $0x10] ss:$8 sps:$4 sm:$0xff]  }
 0x120   :  { %2012 = vmatprep.subr.bf16.mxu1 %v3434_v1  ;;  %v3537_v0 = vld [vmem:[#allocation8 + $0x130] ss:$8 sps:$4 sm:$0xff]   ;;  %v3500_v1 = vld [vmem:[#allocation8 + $0x4] ss:$8 sps:$4 sm:$0xff]  }
 0x122   :  { %1972 = vmatpush2.bf16.msra.mxu0 %v3429_v2  ;;  %v3542_v2 = vld [vmem:[#allocation8 + $0x124] ss:$8 sps:$4 sm:$0xff]  }
 0x123   :  { %2013 = vmatpush2.bf16.msra.mxu1 %v3432_v4  ;;  %1973 = vmatprep.subr.bf16.mxu0 %v3437_v5  ;;  %v3498_v4 = vld [vmem:[#allocation8] ss:$8 sps:$4 sm:$0xff]  }
 0x124   :  { %2014 = vmatprep.subr.bf16.mxu1 %v3440_v6  ;;  %v3540_v5 = vld [vmem:[#allocation8 + $0x120] ss:$8 sps:$4 sm:$0xff]   ;;  %v3503_v6 = vld [vmem:[#allocation8 + $0xf4] ss:$8 sps:$4 sm:$0xff]  }
 0x126   :  { %1974 = vmatpush2.bf16.msra.mxu0 %v3435_v7  ;;  %v3545_v7 = vld [vmem:[#allocation8 + $0x114] ss:$8 sps:$4 sm:$0xff]  }
 0x127   :  { %2015 = vmatpush2.bf16.msra.mxu1 %v3438_v8  ;;  %1975 = vmatprep.subr.bf16.mxu0 %v3443_v9  ;;  %v3501_v8 = vld [vmem:[#allocation8 + $0xf0] ss:$8 sps:$4 sm:$0xff]  }
 0x128   :  { %2016 = vmatprep.subr.bf16.mxu1 %v3446_v10  ;;  %v3543_v9 = vld [vmem:[#allocation8 + $0x110] ss:$8 sps:$4 sm:$0xff]   ;;  %v3506_v10 = vld [vmem:[#allocation8 + $0xe4] ss:$8 sps:$4 sm:$0xff]  }
 0x12a   :  { %1976 = vmatpush2.bf16.msra.mxu0 %v3441_v11  ;;  %v3548_v11 = vld [vmem:[#allocation8 + $0x104] ss:$8 sps:$4 sm:$0xff]  }
 0x12b   :  { %2017 = vmatpush2.bf16.msra.mxu1 %v3444_v12  ;;  %1977 = vmatprep.subr.bf16.mxu0 %v3449_v13  ;;  %v3504_v12 = vld [vmem:[#allocation8 + $0xe0] ss:$8 sps:$4 sm:$0xff]  }
 0x12c   :  { %2018 = vmatprep.subr.bf16.mxu1 %v3452_v15  ;;  %v3546_v13 = vld [vmem:[#allocation8 + $0x100] ss:$8 sps:$4 sm:$0xff]   ;;  %v3509_v15 = vld [vmem:[#allocation8 + $0xd4] ss:$8 sps:$4 sm:$0xff]  }
 0x12e   :  { %1978 = vmatpush2.bf16.msra.mxu0 %v3447_v16  ;;  %v3551_v16 = vld [vmem:[#allocation8 + $0x1f4] ss:$8 sps:$4 sm:$0xff]  }
 0x12f   :  { %2019 = vmatpush2.bf16.msra.mxu1 %v3450_v17  ;;  %1979 = vmatprep.subr.bf16.mxu0 %v3455_v20  ;;  %v3507_v17 = vld [vmem:[#allocation8 + $0xd0] ss:$8 sps:$4 sm:$0xff]  }
 0x130   :  { %2020 = vmatprep.subr.bf16.mxu1 %v3458_v21  ;;  %v3549_v20 = vld [vmem:[#allocation8 + $0x1f0] ss:$8 sps:$4 sm:$0xff]   ;;  %v3512_v21 = vld [vmem:[#allocation8 + $0xc4] ss:$8 sps:$4 sm:$0xff]  }
 0x132   :  { %1980 = vmatpush2.bf16.msra.mxu0 %v3453_v22  ;;  %v3554_v22 = vld [vmem:[#allocation8 + $0x1e4] ss:$8 sps:$4 sm:$0xff]  }
 0x133   :  { %2021 = vmatpush2.bf16.msra.mxu1 %v3456_v23  ;;  %1981 = vmatprep.subr.bf16.mxu0 %v3461_v25  ;;  %v3510_v23 = vld [vmem:[#allocation8 + $0xc0] ss:$8 sps:$4 sm:$0xff]  }
 0x134   :  { %2022 = vmatprep.subr.bf16.mxu1 %v3464_v26  ;;  %v3552_v25 = vld [vmem:[#allocation8 + $0x1e0] ss:$8 sps:$4 sm:$0xff]   ;;  %v3515_v26 = vld [vmem:[#allocation8 + $0xb4] ss:$8 sps:$4 sm:$0xff]  }
 0x136   :  { %1982 = vmatpush2.bf16.msra.mxu0 %v3459_v27  ;;  %v3557_v27 = vld [vmem:[#allocation8 + $0x1d4] ss:$8 sps:$4 sm:$0xff]  }
 0x137   :  { %2023 = vmatpush2.bf16.msra.mxu1 %v3462_v28  ;;  %1983 = vmatprep.subr.bf16.mxu0 %v3467_v30  ;;  %v3513_v28 = vld [vmem:[#allocation8 + $0xb0] ss:$8 sps:$4 sm:$0xff]  }
 0x138   :  { %2024 = vmatprep.subr.bf16.mxu1 %v3470_v31  ;;  %v3555_v30 = vld [vmem:[#allocation8 + $0x1d0] ss:$8 sps:$4 sm:$0xff]   ;;  %v3518_v31 = vld [vmem:[#allocation8 + $0xa4] ss:$8 sps:$4 sm:$0xff]  }
 0x13a   :  { %1984 = vmatpush2.bf16.msra.mxu0 %v3465_v32  ;;  %v3560_v32 = vld [vmem:[#allocation8 + $0x1c4] ss:$8 sps:$4 sm:$0xff]  }
 0x13b   :  { %2025 = vmatpush2.bf16.msra.mxu1 %v3468_v33  ;;  %1985 = vmatprep.subr.bf16.mxu0 %v3473_v34  ;;  %v3516_v33 = vld [vmem:[#allocation8 + $0xa0] ss:$8 sps:$4 sm:$0xff]  }
 0x13c   :  { %2026 = vmatprep.subr.bf16.mxu1 %v3476_v35  ;;  %v3558_v34 = vld [vmem:[#allocation8 + $0x1c0] ss:$8 sps:$4 sm:$0xff]   ;;  %v3521_v35 = vld [vmem:[#allocation8 + $0x94] ss:$8 sps:$4 sm:$0xff]  }
 0x13e   :  { %1986 = vmatpush2.bf16.msra.mxu0 %v3471_v36  ;;  %v3563_v36 = vld [vmem:[#allocation8 + $0x1b4] ss:$8 sps:$4 sm:$0xff]  }
 0x13f   :  { %2027 = vmatpush2.bf16.msra.mxu1 %v3474_v37  ;;  %2441 = vmatprep.subr.bf16.mxu0 %v3479_v38  ;;  %v353_v37 = vsub.s32 0, %v3785_v42  ;;  %v3837_v38 = vld [vmem:[#allocation7] sm:$0xf] }
 0x141   :  { %v3826_v41 = vpop.f32.mrf.mxu0  ;;  %1988 = vmatmul.mubr.bf16.vlgmr.msra.gmra.mxu0 %v3790_v63  ;;  %v3527_v63 = vld [vmem:[#allocation8 + $0x174] ss:$8 sps:$4 sm:$0xff]  }
 0x142   :  { %v3828_v43 = vpop.f32.mrf.mxu1  ;;  %2029 = vmatmul.mubr.bf16.vlgmr.msra.gmra.mxu1 %v3816_v29  ;;  %2442 = vmatpush1.bf16.msra.mxu0 %v3477_v39  ;;  %v3486_v29 = vld [vmem:[#allocation8 + $0x40] ss:$8 sps:$4 sm:$0xff]   ;;  %v357_v39 = vsub.s32 1, %v3785_v42 }
 0x143   :  { %v3832_v45 = vpop.f32.mrf.mxu0  ;;  %2443 = vmatprep.subr.bf16.mxu0 %v3482_v40  ;;  %2482 = vmatprep.subr.bf16.mxu1 %v3527_v63  ;;  %v3519_v40 = vld [vmem:[#allocation8 + $0x90] ss:$8 sps:$4 sm:$0xff]   ;;  %v3564_v63 = vld [vmem:[#allocation8 + $0x1a0] ss:$8 sps:$4 sm:$0xff]  }
 0x144   :  { %v3834_v46 = vpop.f32.mrf.mxu1  ;;  %2483 = vmatpush1.bf16.msra.mxu1 %v3525_v50 }
 0x145   :  { %v1747_v62 = vpop.f32.mrf.mxu0  ;;  %2484 = vmatprep.subr.bf16.mxu1 %v3530_v51 }
 0x146   :  { %v1788_v14 = vpop.f32.mrf.mxu1  ;;  %2444 = vmatpush1.bf16.msra.mxu0 %v3480_v44  ;;  %v3561_v44 = vld [vmem:[#allocation8 + $0x1b0] ss:$8 sps:$4 sm:$0xff]   ;;  %v354_v62 = vrot.slane %v3837_v38, %v353_v37 }
 0x147   :  { %v1748_v19 = vpop.f32.mrf.mxu0  ;;  %2445 = vmatprep.subr.bf16.mxu0 %v3485_v47  ;;  %v3524_v47 = vld [vmem:[#allocation8 + $0x84] ss:$8 sps:$4 sm:$0xff]   ;;  %v358_v14 = vrot.slane %v3837_v38, %v357_v39 }
 0x148   :  { %v1789_v48 = vpop.f32.mrf.mxu1  ;;  %2485 = vmatpush1.bf16.msra.mxu1 %v3528_v52  ;;  %v1744_v19 = vadd.f32 %v3826_v41, %v354_v62  ;;  %v3567_v41 = vld [vmem:[#allocation8 + $0x190] ss:$8 sps:$4 sm:$0xff]  }
 0x149   :  { %2486 = vmatprep.subr.bf16.mxu1 %v3533_v24  ;;  %v1746_v48 = vadd.f32 %v3832_v45, %v358_v14 }
 0x14a   :  { %2446 = vmatpush1.bf16.msra.mxu0 %v3483_v3  ;;  %v3522_v3 = vld [vmem:[#allocation8 + $0x80] ss:$8 sps:$4 sm:$0xff]   ;;  %v1785_v50 = vadd.f32 %v3828_v43, %v1744_v19 }
 0x14b   :  { %2447 = vmatprep.subr.bf16.mxu0 %v3488_v49  ;;  %v3566_v49 = vld [vmem:[#allocation8 + $0x1a4] ss:$8 sps:$4 sm:$0xff]   ;;  %v1787_v52 = vadd.f32 %v3834_v46, %v1746_v48 }
 0x14c   :  { %2487 = vmatpush1.bf16.msra.mxu1 %v3531_v54  ;;  %v3569_v54 = vld [vmem:[#allocation8 + $0x194] ss:$8 sps:$4 sm:$0xff]  }
 0x14d   :  { %2488 = vmatprep.subr.bf16.mxu1 %v3536_v56 }
 0x14e   :  { %2448 = vmatpush1.bf16.msra.mxu0 %v3486_v29 }
 0x14f   :  { %2449 = vmatprep.subr.bf16.mxu0 %v3491_v18 }
 0x150   :  { %2489 = vmatpush1.bf16.msra.mxu1 %v3534_v58 }
 0x151   :  { %2490 = vmatprep.subr.bf16.mxu1 %v3539_v60 }
 0x152   :  { %2450 = vmatpush1.bf16.msra.mxu0 %v3489_v53 }
 0x153   :  { %2451 = vmatprep.subr.bf16.mxu0 %v3494_v55 }
 0x154   :  { %2491 = vmatpush1.bf16.msra.mxu1 %v3537_v0 }
 0x155   :  { %2492 = vmatprep.subr.bf16.mxu1 %v3542_v2 }
 0x156   :  { %2452 = vmatpush1.bf16.msra.mxu0 %v3492_v57 }
 0x157   :  { %2453 = vmatprep.subr.bf16.mxu0 %v3497_v59 }
 0x158   :  { %2493 = vmatpush1.bf16.msra.mxu1 %v3540_v5 }
 0x159   :  { %2494 = vmatprep.subr.bf16.mxu1 %v3545_v7 }
 0x15a   :  { %2454 = vmatpush1.bf16.msra.mxu0 %v3495_v61  ;;  %v3572_v61 = vld [vmem:[#allocation8 + $0x184] ss:$8 sps:$4 sm:$0xff]  }
 0x15b   :  { %2455 = vmatprep.subr.bf16.mxu0 %v3500_v1  ;;  %v3570_v1 = vld [vmem:[#allocation8 + $0x180] ss:$8 sps:$4 sm:$0xff]  }
 0x15c   :  { %2495 = vmatpush1.bf16.msra.mxu1 %v3543_v9 }
 0x15d   :  { %2496 = vmatprep.subr.bf16.mxu1 %v3548_v11 }
 0x15e   :  { %2456 = vmatpush1.bf16.msra.mxu0 %v3498_v4 }
 0x15f   :  { %2457 = vmatprep.subr.bf16.mxu0 %v3503_v6 }
 0x160   :  { %2497 = vmatpush1.bf16.msra.mxu1 %v3546_v13  ;;  %v3574_v13 = vld [vmem:[#allocation10 + $0x38] sm:$0xff]  }
 0x161   :  { %2498 = vmatprep.subr.bf16.mxu1 %v3551_v16  ;;  %v3576_v16 = vld [vmem:[#allocation10 + $0x30] sm:$0xff]  }
 0x162   :  { %2458 = vmatpush2.bf16.msra.mxu0 %v3501_v8 }
 0x163   :  { %2459 = vmatprep.subr.bf16.mxu0 %v3506_v10 }
 0x164   :  { %2499 = vmatpush2.bf16.msra.mxu1 %v3549_v20  ;;  %v3578_v20 = vld [vmem:[#allocation10 + $0x28] sm:$0xff]  }
 0x165   :  { %2500 = vmatprep.subr.bf16.mxu1 %v3554_v22  ;;  %v3580_v22 = vld [vmem:[#allocation10 + $0x20] sm:$0xff]  }
 0x166   :  { %2460 = vmatpush2.bf16.msra.mxu0 %v3504_v12  ;;  %v3573_v12 = vld [vmem:[#allocation10 + $0x78] sm:$0xff]  }
 0x167   :  { %2461 = vmatprep.subr.bf16.mxu0 %v3509_v15  ;;  %v3575_v15 = vld [vmem:[#allocation10 + $0x70] sm:$0xff]  }
 0x168   :  { %2501 = vmatpush2.bf16.msra.mxu1 %v3552_v25  ;;  %v3582_v25 = vld [vmem:[#allocation10 + $0x18] sm:$0xff]  }
 0x169   :  { %2502 = vmatprep.subr.bf16.mxu1 %v3557_v27  ;;  %v3584_v27 = vld [vmem:[#allocation10 + $0x10] sm:$0xff]  }
 0x16a   :  { %2462 = vmatpush2.bf16.msra.mxu0 %v3507_v17  ;;  %v3577_v17 = vld [vmem:[#allocation10 + $0x68] sm:$0xff]  }
 0x16b   :  { %2463 = vmatprep.subr.bf16.mxu0 %v3512_v21  ;;  %v3579_v21 = vld [vmem:[#allocation10 + $0x60] sm:$0xff]  }
 0x16c   :  { %2503 = vmatpush2.bf16.msra.mxu1 %v3555_v30  ;;  %v365_v30 = vsub.s32 3, %v3785_v42 }
 0x16d   :  { %2504 = vmatprep.subr.bf16.mxu1 %v3560_v32 }
 0x16e   :  { %2464 = vmatpush2.bf16.msra.mxu0 %v3510_v23  ;;  %v3581_v23 = vld [vmem:[#allocation10 + $0x58] sm:$0xff]   ;;  %v366_v32 = vrot.slane %v3837_v38, %v365_v30 }
 0x16f   :  { %2465 = vmatprep.subr.bf16.mxu0 %v3515_v26  ;;  %v3583_v26 = vld [vmem:[#allocation10 + $0x50] sm:$0xff]  }
 0x170   :  { %2505 = vmatpush2.bf16.msra.mxu1 %v3558_v34 }
 0x171   :  { %2506 = vmatprep.subr.bf16.mxu1 %v3563_v36 }
 0x172   :  { %2466 = vmatpush2.bf16.msra.mxu0 %v3513_v28  ;;  %v361_v28 = vsub.s32 2, %v3785_v42  ;;  %v3040_v42 = vld [vmem:[%s3873_s6] ss:$0 sm:$0xff] }
 0x173   :  { %2467 = vmatprep.subr.bf16.mxu0 %v3518_v31 }
 0x174   :  { %2507 = vmatpush2.bf16.msra.mxu1 %v3561_v44  ;;  %v362_v31 = vrot.slane %v3837_v38, %v361_v28 }
 0x175   :  { %2508 = vmatprep.subr.bf16.mxu1 %v3566_v49 }
 0x176   :  { %2468 = vmatpush2.bf16.msra.mxu0 %v3516_v33 }
 0x177   :  { %2469 = vmatprep.subr.bf16.mxu0 %v3521_v35 }
 0x178   :  { %2509 = vmatpush2.bf16.msra.mxu1 %v3564_v63 }
 0x179   :  { %2510 = vmatprep.subr.bf16.mxu1 %v3569_v54  ;;  %v3586_v54 = vld [vmem:[#allocation10 + $0x8] sm:$0xff]  }
 0x17a   :  { %2470 = vmatpush2.bf16.msra.mxu0 %v3519_v40 }
 0x17b   :  { %2471 = vmatprep.subr.bf16.mxu0 %v3524_v47 }
 0x17c   :  { %2511 = vmatpush2.bf16.msra.mxu1 %v3567_v41  ;;  %v3587_v41 = vld [vmem:[#allocation10 + $0x40] sm:$0xff]  }
 0x17d   :  { %2512 = vmatprep.subr.bf16.mxu1 %v3572_v61 }
 0x17e   :  { %2472 = vmatpush2.bf16.msra.mxu0 %v3522_v3 }
 0x17f   :  { %3057 = vmatprep.subr.bf16.mxu0 %v3573_v12 }
 0x180   :  { %2513 = vmatpush2.bf16.msra.mxu1 %v3570_v1 }
 0x181   :  { %v1825_v51 = vpop.f32.mrf.mxu0 }
 0x182   :  { %v1866_v29 = vpop.f32.mrf.mxu1  ;;  %v1826_v18 = vadd.f32 %v1825_v51, %v1785_v50 }
 0x183   :  { %v1827_v24 = vpop.f32.mrf.mxu0 }
 0x184   :  { %v1868_v53 = vpop.f32.mrf.mxu1  ;;  %v1867_v55 = vadd.f32 %v1866_v29, %v1826_v18  ;;  %v1828_v56 = vadd.f32 %v1827_v24, %v1787_v52 }
 0x185   :  { %v1829_v57 = vpop.f32.mrf.mxu0 }
 0x186   :  { %v1870_v45 = vpop.f32.mrf.mxu1  ;;  %v1869_v58 = vadd.f32 %v1868_v53, %v1828_v56  ;;  %v2037_v43 = vmax.f32 %v1867_v55, 0.0  ;;  %v3585_v53 = vld [vmem:[#allocation10 + $0x48] sm:$0xff]   ;;  %v3588_v57 = vld [vmem:[#allocation10] sm:$0xff]  }
 0x187   :  { %v1830_v59 = vpop.f32.mrf.mxu0 }
 0x188   :  { %v1871_v60 = vpop.f32.mrf.mxu1  ;;  %v2038_v0 = vmax.f32 %v1869_v58, 0.0  ;;  %v2041_v2 = vpack.c.bf16 %v2037_v43, %v2037_v43  ;;  %v2109_v58 = vld [vmem:[%s3871_s4] sm:$0x3] }
 0x189   :  { %v2114_v43 = vrot.slane %v2109_v58, %v353_v37  ;;  %v2118_v59 = vrot.slane %v2109_v58, %v357_v39 }
 0x18a   :  { %v2042_v46 = vpack.c.bf16 %v2038_v0, %v2038_v0 }
 0x18c   :  { %2473 = vmatprep.mubr.bf16.mxu0 %v2042_v46 }
 0x18d   :  { %2474 = vmatmul.mubr.bf16.vlgmr.msra.gmra.mxu0 %v2041_v2 }
 0x18e   :  { %3058 = vmatpush3.bf16.msra.mxu0 %v3574_v13 }
 0x18f   :  { %3059 = vmatprep.subr.bf16.mxu0 %v3575_v15 }
 0x192   :  { %3060 = vmatpush3.bf16.msra.mxu0 %v3576_v16 }
 0x193   :  { %3061 = vmatprep.subr.bf16.mxu0 %v3577_v17 }
 0x196   :  { %3062 = vmatpush3.bf16.msra.mxu0 %v3578_v20 }
 0x197   :  { %3063 = vmatprep.subr.bf16.mxu0 %v3579_v21 }
 0x19a   :  { %3064 = vmatpush3.bf16.msra.mxu0 %v3580_v22 }
 0x19b   :  { %3065 = vmatprep.subr.bf16.mxu0 %v3581_v23 }
 0x19e   :  { %3066 = vmatpush3.bf16.msra.mxu0 %v3582_v25 }
 0x19f   :  { %3067 = vmatprep.subr.bf16.mxu0 %v3583_v26 }
 0x1a2   :  { %3068 = vmatpush3.bf16.msra.mxu0 %v3584_v27 }
 0x1a3   :  { %3069 = vmatprep.subr.bf16.mxu0 %v3585_v53 }
 0x1a6   :  { %3070 = vmatpush3.bf16.msra.mxu0 %v3586_v54 }
 0x1a7   :  { %3071 = vmatprep.subr.bf16.mxu0 %v3587_v41 }
 0x1aa   :  { %3072 = vmatpush3.bf16.msra.mxu0 %v3588_v57 }
 0x1c1   :  { %v1907_v4 = vpop.f32.mrf.mxu0 }
 0x1c2   :  { %v1948_v5 = vpop.f32.mrf.mxu1  ;;  %v1908_v33 = vadd.f32 %v1907_v4, %v362_v31 }
 0x1c3   :  { %v1909_v6 = vpop.f32.mrf.mxu0 }
 0x1c4   :  { %v1950_v7 = vpop.f32.mrf.mxu1  ;;  %v1910_v34 = vadd.f32 %v1909_v6, %v366_v32  ;;  %v1949_v35 = vadd.f32 %v1948_v5, %v1908_v33 }
 0x1c5   :  { %v1911_v8 = vpop.f32.mrf.mxu0 }
 0x1c6   :  { %v1952_v9 = vpop.f32.mrf.mxu1  ;;  %v1951_v44 = vadd.f32 %v1950_v7, %v1910_v34 }
 0x1c7   :  { %v1912_v10 = vpop.f32.mrf.mxu0 }
 0x1c8   :  { %v1953_v11 = vpop.f32.mrf.mxu1 }
 0x201   :  { %v1989_v36 = vpop.f32.mrf.mxu0 }
 0x202   :  { %v2030_v40 = vpop.f32.mrf.mxu1  ;;  %v1990_v47 = vadd.f32 %v1989_v36, %v1949_v35 }
 0x203   :  { %v1991_v62 = vpop.f32.mrf.mxu0 }
 0x204   :  { %v2032_v14 = vpop.f32.mrf.mxu1  ;;  %v2031_v3 = vadd.f32 %v2030_v40, %v1990_v47  ;;  %v1992_v19 = vadd.f32 %v1991_v62, %v1951_v44 }
 0x205   :  { %v1993_v48 = vpop.f32.mrf.mxu0 }
 0x206   :  { %v2034_v49 = vpop.f32.mrf.mxu1  ;;  %v2033_v50 = vadd.f32 %v2032_v14, %v1992_v19  ;;  %v2039_v63 = vmax.f32 %v2031_v3, 0.0 }
 0x207   :  { %v1994_v51 = vpop.f32.mrf.mxu0 }
 0x208   :  { %v2035_v29 = vpop.f32.mrf.mxu1  ;;  %v2040_v52 = vmax.f32 %v2033_v50, 0.0  ;;  %v2043_v38 = vpack.c.bf16 %v2039_v63, %v2039_v63 }
 0x20a   :  { %v2044_v18 = vpack.c.bf16 %v2040_v52, %v2040_v52 }
 0x20c   :  { %2514 = vmatprep.mubr.bf16.mxu1 %v2044_v18 }
 0x20d   :  { %2515 = vmatmul.mubr.bf16.vlgmr.msra.gmra.mxu1 %v2043_v38 }
 0x24d   :  { %v2475_v24 = vpop.f32.mrf.mxu0 }
 0x24e   :  { %v2476_v60 = vadd.f32 %v2475_v24, %v2114_v43 }
 0x24f   :  { %v2477_v55 = vpop.f32.mrf.mxu0 }
 0x250   :  { %v2478_v0 = vadd.f32 %v2477_v55, %v2118_v59 }
 0x251   :  { %v2479_v56 = vpop.f32.mrf.mxu0 }
 0x253   :  { %v2480_v45 = vpop.f32.mrf.mxu0 }
 0x2cd   :  { %v2516_v61 = vpop.f32.mrf.mxu1 }
 0x2ce   :  { %v2517_v1 = vadd.f32 %v2516_v61, %v2476_v60 }
 0x2cf   :  { %v2518_v46 = vpop.f32.mrf.mxu1 }
 0x2d0   :  { %v2519_v2 = vadd.f32 %v2518_v46, %v2478_v0  ;;  %v2523_v4 = vmax.f32 %v2517_v1, 0.0 }
 0x2d1   :  { %v2520_v5 = vpop.f32.mrf.mxu1 }
 0x2d2   :  { %v2524_v6 = vmax.f32 %v2519_v2, 0.0  ;;  %v2525_v9 = vpack.c.bf16 %v2523_v4, %v2523_v4 }
 0x2d3   :  { %v2521_v7 = vpop.f32.mrf.mxu1 }
 0x2d4   :  { %v2526_v8 = vpack.c.bf16 %v2524_v6, %v2524_v6 }
 0x2d6   :  { %2694 = vmatprep.mubr.bf16.mxu0 %v2526_v8 }
 0x2d7   :  { %2695 = vmatmul.mubr.bf16.vlgmr.msra.gmra.mxu0 %v2525_v9 }
 0x397   :  { %v3073_v10 = vpop.f32.mrf.mxu0 }
 0x399   :  { %v3074_v37 = vpop.f32.mrf.mxu0 }
 0x39a   :  { %v3075_v39 = vadd.f32 %v3074_v37, %v3073_v10 }
 0x39b   :  { %v3076_v11 = vpop.f32.mrf.mxu0 }
 0x39c   :  { %v2697_v12 = vadd.f32 %v3075_v39, %v3040_v42 }
 0x39d   :  { %v3077_v13 = vpop.f32.mrf.mxu0 }
 0x39e   :  { %2702 = vst [vmem:[#allocation11] sm:$0x3] %v2697_v12 }
 0x39f   :  { %3700 = shalt.err (!%p3697_p1)
}
 0x3a0   :  { %2712 = dma.vmem_to_hbm [thread:$0]  %s2710_s8, 32, %s3874_s7, [#allocation4]  }
 0x3a1   :  { %3715 = dma.done.wait [#allocation4], 32  }
 0x3a2   :  { %3716 = vsyncadd [#allocation4], 4294967264 }
 0x3a3   :  { %2716 = vsyncpa [#allocation3], 1 }
 0x3a4   :  { %2717 = vsyncpa [#allocation6], 1 }
 0x3a5   :  { %2718 = vsyncpa [#allocation9], 1 }
 0x3a6   :  { %2719 = vsyncpa [#allocation4], 1 }

</bundles_post_ra>
